<compile_context>
chip_gen: v5e
topology: v5e:2x2
jax: 0.10.0
libtpu: 0.0.40
codegen_flags: <defaults>
</compile_context>

<pallas_src>
import functools

import jax
import jax.numpy as jnp
from jax.experimental import pallas as pl
from jax.experimental.pallas import tpu as pltpu


# ----------------------------- Pallas kernel --------------------------------

def cre_gnn_kernel(x_ref, a_ref, rp_ref,
                   w_sage_ref, w_lin_ref, w_cls_ref,
                   b_enc_ref, b_cls_ref,
                   logits_ref, *, gp):
    """Fused ShaDow encoder (source+target row-fused) + SoftmaxLoss classifier head.

    All matmuls run on the MXU in bf16 with f32 accumulation.
    """
    f32, bf16 = jnp.float32, jnp.bfloat16

    a = a_ref[...]                         # (2N, 2N) bf16 block-diag mean aggregation
    b_enc = b_enc_ref[...]                 # (4, H)  f32: [b_sage1; b_sage2; b_sage3; b_lin]
    h = x_ref[...]                         # (2N, H) bf16: rows = [source nodes ; target nodes]

    # --- 3 x SAGEConv('mean') + ReLU, K=2H concatenated matmuls --------------
    for layer in range(3):                 # static unroll
        agg = jnp.dot(a, h, preferred_element_type=f32)            # mean over in-edges
        hin = jnp.concatenate([agg.astype(bf16), h], axis=-1)      # (2N, 2H)
        out = (jnp.dot(hin, w_sage_ref[layer], preferred_element_type=f32)
               + b_enc[layer:layer + 1, :])
        h = jnp.maximum(out, 0.0).astype(bf16)                     # ReLU, back to bf16
        # TODO(synk): dropout(p=0.3) between layers skipped (eval semantics);
        # training parity would use pltpu.prng_seed / pltpu.prng_random_bits here.

    # --- ShaDow readout: one MXU pass -> [root_s ; root_t ; pool_s ; pool_t] --
    ro = jnp.dot(rp_ref[...], h, preferred_element_type=f32)       # (4*Gp, H)
    cat_ro = jnp.concatenate([ro[:2 * gp].astype(bf16),            # [root | pool]
                              ro[2 * gp:].astype(bf16)], axis=-1)  # (2*Gp, 2H)
    emb = (jnp.dot(cat_ro, w_lin_ref[...], preferred_element_type=f32)
           + b_enc[3:4, :])                                        # (2*Gp, H)

    # --- SoftmaxLoss head: logits = cat([u, v, |u-v|]) @ W + b (K=3H) ---------
    u, v = emb[:gp], emb[gp:]
    d = jnp.abs(u - v)
    feat = jnp.concatenate([u.astype(bf16), v.astype(bf16), d.astype(bf16)], axis=-1)
    logits_ref[...] = (jnp.dot(feat, w_cls_ref[...], preferred_element_type=f32)
                       + b_cls_ref[...])                           # (Gp, LP) lane-dense


# ------------------------------- JAX wrappers --------------------------------

def run_cre_gnn(x_fused, a_fused, rp_fused, params):
    """One fused pallas_call: both ShaDow passes (row-fused) + classifier head."""
    gp = rp_fused.shape[0] // 4
    n2, h = x_fused.shape
    lp = params["b_cls"].shape[-1]
    args = (x_fused, a_fused, rp_fused,
            params["w_sage"], params["w_lin"], params["w_cls"],
            params["b_enc"], params["b_cls"])

    flops = int(3 * (2 * n2 * n2 * h + 2 * n2 * (2 * h) * h)   # 3 SAGE layers
                + 2 * (4 * gp) * n2 * h                        # readout
                + 2 * (2 * gp) * (2 * h) * h                   # ShaDow linear
                + 2 * gp * (3 * h) * lp)                       # classifier head
    bytes_accessed = int(sum(v.size * v.dtype.itemsize for v in args) + gp * lp * 4)

    kernel = functools.partial(cre_gnn_kernel, gp=gp)
    return pl.pallas_call(
        kernel,
        out_shape=jax.ShapeDtypeStruct((gp, lp), jnp.float32),
        in_specs=[pl.BlockSpec(memory_space=pltpu.MemorySpace.VMEM)] * len(args),
        out_specs=pl.BlockSpec(memory_space=pltpu.MemorySpace.VMEM),
        cost_estimate=pl.CostEstimate(flops=flops, transcendentals=0,
                                      bytes_accessed=bytes_accessed),
    )(*args)


def cross_entropy(logits, labels):
    # Mean cross-entropy over integer labels (SoftmaxLoss uses nn.CrossEntropyLoss).
    lse = jax.scipy.special.logsumexp(logits, axis=-1)
    picked = jnp.take_along_axis(logits, labels[:, None].astype(jnp.int32), axis=-1)[:, 0]
    return jnp.mean(lse - picked)


@jax.jit
def cre_gnn_forward(x_fused, a_fused, rp_fused, labels, params):
    logits_pad = run_cre_gnn(x_fused, a_fused, rp_fused, params)   # (Gp, 128)
    num_graphs = labels.shape[0]
    cre_logits = logits_pad[:num_graphs, :2]                       # (G, 2)
    loss_cre = cross_entropy(cre_logits, labels)
    return loss_cre, {"loss": loss_cre}, cre_logits


# ----------------------------- graph preprocessing ---------------------------

def build_fused_graph_ops(edge_index_s, batch_s, root_n_id_s,
                          edge_index_t, batch_t, root_n_id_t,
                          num_nodes, num_graphs, num_graphs_padded):
    """Dense bf16 operators for the row-fused (source;target) encoder pass."""
    def mean_adj(edge_index):
        src, dst = edge_index[0], edge_index[1]
        a = jnp.zeros((num_nodes, num_nodes), jnp.float32).at[dst, src].add(1.0)
        deg = jnp.maximum(a.sum(axis=1, keepdims=True), 1.0)
        return a / deg                                              # mean aggregation

    def readout(batch, root_n_id):
        pool = (jnp.arange(num_graphs)[:, None] == batch[None, :]).astype(jnp.float32)
        pool = pool / jnp.maximum(pool.sum(axis=1, keepdims=True), 1.0)  # global_mean_pool
        root = jax.nn.one_hot(root_n_id, num_nodes, dtype=jnp.float32)   # x[root_n_id]
        pad = num_graphs_padded - num_graphs
        return (jnp.pad(root, ((0, pad), (0, 0))),
                jnp.pad(pool, ((0, pad), (0, 0))))

    a_s, a_t = mean_adj(edge_index_s), mean_adj(edge_index_t)
    n2 = 2 * num_nodes
    a = jnp.zeros((n2, n2), jnp.float32)
    a = a.at[:num_nodes, :num_nodes].set(a_s)
    a = a.at[num_nodes:, num_nodes:].set(a_t)                       # block-diagonal

    root_s, pool_s = readout(batch_s, root_n_id_s)
    root_t, pool_t = readout(batch_t, root_n_id_t)
    z = jnp.zeros((num_graphs_padded, num_nodes), jnp.float32)
    rp = jnp.concatenate([jnp.concatenate([root_s, z], axis=1),
                          jnp.concatenate([z, root_t], axis=1),
                          jnp.concatenate([pool_s, z], axis=1),
                          jnp.concatenate([z, pool_t], axis=1)], axis=0)  # (4*Gp, 2N)
    return a.astype(jnp.bfloat16), rp.astype(jnp.bfloat16)


def init_params(key, hidden, num_labels=2, labels_padded=128):
    ks = jax.random.split(key, 9)
    H = hidden

    def w(k, shape, fan_in):
        return (jax.random.normal(k, shape, jnp.float32)
                / jnp.sqrt(fan_in)).astype(jnp.bfloat16)

    # SAGEConv 1..3: per-layer vstack([lin_l, lin_r]) -> (3, 2H, H)
    w_sage = jnp.stack([
        jnp.concatenate([w(ks[0], (H, H), H), w(ks[1], (H, H), H)], axis=0),
        jnp.concatenate([w(ks[2], (H, H), H), w(ks[3], (H, H), H)], axis=0),
        jnp.concatenate([w(ks[4], (H, H), H), w(ks[5], (H, H), H)], axis=0)], axis=0)
    # ShaDow Linear(2H, H): vstack([w_root, w_graph])
    w_lin = jnp.concatenate([w(ks[6], (H, H), 2 * H), w(ks[7], (H, H), 2 * H)], axis=0)
    # SoftmaxLoss classifier Linear(3H, 2) padded to 128 output lanes.
    w_cls_full = jax.random.normal(ks[8], (3 * H, num_labels), jnp.float32) / jnp.sqrt(3 * H)
    w_cls = jnp.pad(w_cls_full,
                    ((0, 0), (0, labels_padded - num_labels))).astype(jnp.bfloat16)

    return {
        "w_sage": w_sage,                                   # (3, 2H, H) bf16
        "w_lin": w_lin,                                     # (2H, H)    bf16
        "w_cls": w_cls,                                     # (3H, LP)   bf16
        "b_enc": jnp.zeros((4, H), jnp.float32),            # sage1..3 biases + shadow lin bias
        "b_cls": jnp.zeros((1, labels_padded), jnp.float32),
    }


# ----------------------------------- main -------------------------------------

if __name__ == "__main__":
    key = jax.random.PRNGKey(0)
    k_xs, k_xt, k_es, k_et, k_p = jax.random.split(key, 5)

    H = 128                  # config.hidden_size (lane-dense: multiple of 128)
    G = 2                    # graph pairs per batch
    GP = 8                   # graphs padded to a sublane multiple of 8
    LP = 128                 # classifier output lanes (num_labels=2 padded)
    NODES_PER_GRAPH = 32
    N = G * NODES_PER_GRAPH  # 64 nodes per side -> 128 fused node rows
    E_PER_GRAPH = 64

    x_s = jax.random.normal(k_xs, (N, H), jnp.float32)
    x_t = jax.random.normal(k_xt, (N, H), jnp.float32)

    def make_edges(k):
        ks1, ks2 = jax.random.split(k)
        src = jax.random.randint(ks1, (G, E_PER_GRAPH), 0, NODES_PER_GRAPH)
        dst = jax.random.randint(ks2, (G, E_PER_GRAPH), 0, NODES_PER_GRAPH)
        offs = (jnp.arange(G) * NODES_PER_GRAPH)[:, None]
        return jnp.stack([(src + offs).reshape(-1), (dst + offs).reshape(-1)], axis=0)

    edge_index_s = make_edges(k_es)
    edge_index_t = make_edges(k_et)

    batch = jnp.repeat(jnp.arange(G), NODES_PER_GRAPH)       # node -> graph id
    root_n_id = jnp.arange(G) * NODES_PER_GRAPH              # first node of each graph
    labels = jnp.array([0, 1], dtype=jnp.int32)

    a_fused, rp_fused = build_fused_graph_ops(
        edge_index_s, batch, root_n_id,
        edge_index_t, batch, root_n_id,
        num_nodes=N, num_graphs=G, num_graphs_padded=GP)
    x_fused = jnp.concatenate([x_s, x_t], axis=0).astype(jnp.bfloat16)   # (2N, H)

    params = init_params(k_p, H, num_labels=2, labels_padded=LP)

    loss, details, logits = cre_gnn_forward(x_fused, a_fused, rp_fused, labels, params)
    jax.block_until_ready((loss, logits))
    assert logits.shape == (G, 2) and bool(jnp.isfinite(loss))
    print("KERNEL_OK")
</pallas_src>

<mosaic_0001>
module attributes {stable_mosaic.version = 11 : i64} {
  func.func @cre_gnn_kernel(%arg0: memref<128x128xbf16, #tpu.memory_space<vmem>>, %arg1: memref<128x128xbf16, #tpu.memory_space<vmem>>, %arg2: memref<32x128xbf16, #tpu.memory_space<vmem>>, %arg3: memref<3x256x128xbf16, #tpu.memory_space<vmem>>, %arg4: memref<256x128xbf16, #tpu.memory_space<vmem>>, %arg5: memref<384x128xbf16, #tpu.memory_space<vmem>>, %arg6: memref<4x128xf32, #tpu.memory_space<vmem>>, %arg7: memref<1x128xf32, #tpu.memory_space<vmem>>, %arg8: memref<8x128xf32, #tpu.memory_space<vmem>>) attributes {dimension_semantics = [], scalar_prefetch = 0 : i64, scratch_operands = 0 : i64, tpu.core_type = #tpu.core_type<tc>} {
    %c0 = arith.constant 0 : index
    %c0_0 = arith.constant 0 : index
    %0 = vector.load %arg1[%c0, %c0_0] : memref<128x128xbf16, #tpu.memory_space<vmem>>, vector<128x128xbf16>
    %c0_1 = arith.constant 0 : index
    %c0_2 = arith.constant 0 : index
    %1 = vector.load %arg6[%c0_1, %c0_2] : memref<4x128xf32, #tpu.memory_space<vmem>>, vector<4x128xf32>
    %c0_3 = arith.constant 0 : index
    %c0_4 = arith.constant 0 : index
    %2 = vector.load %arg0[%c0_3, %c0_4] : memref<128x128xbf16, #tpu.memory_space<vmem>>, vector<128x128xbf16>
    %cst = arith.constant dense<0.000000e+00> : vector<128x128xf32>
    %3 = tpu.matmul %0, %2, %cst {dimension_numbers = #tpu.dot_dimension_numbers<[1], [0], [0], [1], [0, 0, 1, 1], [], []>} : vector<128x128xbf16>, vector<128x128xbf16>, vector<128x128xf32> -> vector<128x128xf32>
    %4 = arith.truncf %3 : vector<128x128xf32> to vector<128x128xbf16>
    %5 = tpu.concatenate %4, %2 in 1 : vector<128x128xbf16>, vector<128x128xbf16> -> vector<128x256xbf16>
    %c0_5 = arith.constant 0 : index
    %c0_6 = arith.constant 0 : index
    %c0_7 = arith.constant 0 : index
    %6 = vector.load %arg3[%c0_5, %c0_6, %c0_7] : memref<3x256x128xbf16, #tpu.memory_space<vmem>>, vector<1x256x128xbf16>
    %7 = vector.shape_cast %6 : vector<1x256x128xbf16> to vector<256x128xbf16>
    %cst_8 = arith.constant dense<0.000000e+00> : vector<128x128xf32>
    %8 = tpu.matmul %5, %7, %cst_8 {dimension_numbers = #tpu.dot_dimension_numbers<[1], [0], [0], [1], [0, 0, 1, 1], [], []>} : vector<128x256xbf16>, vector<256x128xbf16>, vector<128x128xf32> -> vector<128x128xf32>
    %9 = vector.extract_strided_slice %1 {offsets = [0, 0], sizes = [1, 128], strides = [1, 1]} : vector<4x128xf32> to vector<1x128xf32>
    %10 = vector.broadcast %9 : vector<1x128xf32> to vector<128x128xf32>
    %11 = arith.addf %8, %10 : vector<128x128xf32>
    %cst_9 = arith.constant 0.000000e+00 : f32
    %12 = vector.broadcast %cst_9 : f32 to vector<128x128xf32>
    %13 = arith.maximumf %11, %12 : vector<128x128xf32>
    %14 = arith.truncf %13 : vector<128x128xf32> to vector<128x128xbf16>
    %cst_10 = arith.constant dense<0.000000e+00> : vector<128x128xf32>
    %15 = tpu.matmul %0, %14, %cst_10 {dimension_numbers = #tpu.dot_dimension_numbers<[1], [0], [0], [1], [0, 0, 1, 1], [], []>} : vector<128x128xbf16>, vector<128x128xbf16>, vector<128x128xf32> -> vector<128x128xf32>
    %16 = arith.truncf %15 : vector<128x128xf32> to vector<128x128xbf16>
    %17 = tpu.concatenate %16, %14 in 1 : vector<128x128xbf16>, vector<128x128xbf16> -> vector<128x256xbf16>
    %c1 = arith.constant 1 : index
    %c0_11 = arith.constant 0 : index
    %c0_12 = arith.constant 0 : index
    %18 = vector.load %arg3[%c1, %c0_11, %c0_12] : memref<3x256x128xbf16, #tpu.memory_space<vmem>>, vector<1x256x128xbf16>
    %19 = vector.shape_cast %18 : vector<1x256x128xbf16> to vector<256x128xbf16>
    %cst_13 = arith.constant dense<0.000000e+00> : vector<128x128xf32>
    %20 = tpu.matmul %17, %19, %cst_13 {dimension_numbers = #tpu.dot_dimension_numbers<[1], [0], [0], [1], [0, 0, 1, 1], [], []>} : vector<128x256xbf16>, vector<256x128xbf16>, vector<128x128xf32> -> vector<128x128xf32>
    %21 = vector.extract_strided_slice %1 {offsets = [1, 0], sizes = [1, 128], strides = [1, 1]} : vector<4x128xf32> to vector<1x128xf32>
    %22 = vector.broadcast %21 : vector<1x128xf32> to vector<128x128xf32>
    %23 = arith.addf %20, %22 : vector<128x128xf32>
    %cst_14 = arith.constant 0.000000e+00 : f32
    %24 = vector.broadcast %cst_14 : f32 to vector<128x128xf32>
    %25 = arith.maximumf %23, %24 : vector<128x128xf32>
    %26 = arith.truncf %25 : vector<128x128xf32> to vector<128x128xbf16>
    %cst_15 = arith.constant dense<0.000000e+00> : vector<128x128xf32>
    %27 = tpu.matmul %0, %26, %cst_15 {dimension_numbers = #tpu.dot_dimension_numbers<[1], [0], [0], [1], [0, 0, 1, 1], [], []>} : vector<128x128xbf16>, vector<128x128xbf16>, vector<128x128xf32> -> vector<128x128xf32>
    %28 = arith.truncf %27 : vector<128x128xf32> to vector<128x128xbf16>
    %29 = tpu.concatenate %28, %26 in 1 : vector<128x128xbf16>, vector<128x128xbf16> -> vector<128x256xbf16>
    %c2 = arith.constant 2 : index
    %c0_16 = arith.constant 0 : index
    %c0_17 = arith.constant 0 : index
    %30 = vector.load %arg3[%c2, %c0_16, %c0_17] : memref<3x256x128xbf16, #tpu.memory_space<vmem>>, vector<1x256x128xbf16>
    %31 = vector.shape_cast %30 : vector<1x256x128xbf16> to vector<256x128xbf16>
    %cst_18 = arith.constant dense<0.000000e+00> : vector<128x128xf32>
    %32 = tpu.matmul %29, %31, %cst_18 {dimension_numbers = #tpu.dot_dimension_numbers<[1], [0], [0], [1], [0, 0, 1, 1], [], []>} : vector<128x256xbf16>, vector<256x128xbf16>, vector<128x128xf32> -> vector<128x128xf32>
    %33 = vector.extract_strided_slice %1 {offsets = [2, 0], sizes = [1, 128], strides = [1, 1]} : vector<4x128xf32> to vector<1x128xf32>
    %34 = vector.broadcast %33 : vector<1x128xf32> to vector<128x128xf32>
    %35 = arith.addf %32, %34 : vector<128x128xf32>
    %cst_19 = arith.constant 0.000000e+00 : f32
    %36 = vector.broadcast %cst_19 : f32 to vector<128x128xf32>
    %37 = arith.maximumf %35, %36 : vector<128x128xf32>
    %38 = arith.truncf %37 : vector<128x128xf32> to vector<128x128xbf16>
    %c0_20 = arith.constant 0 : index
    %c0_21 = arith.constant 0 : index
    %39 = vector.load %arg2[%c0_20, %c0_21] : memref<32x128xbf16, #tpu.memory_space<vmem>>, vector<32x128xbf16>
    %cst_22 = arith.constant dense<0.000000e+00> : vector<32x128xf32>
    %40 = tpu.matmul %39, %38, %cst_22 {dimension_numbers = #tpu.dot_dimension_numbers<[1], [0], [0], [1], [0, 0, 1, 1], [], []>} : vector<32x128xbf16>, vector<128x128xbf16>, vector<32x128xf32> -> vector<32x128xf32>
    %41 = vector.extract_strided_slice %40 {offsets = [0, 0], sizes = [16, 128], strides = [1, 1]} : vector<32x128xf32> to vector<16x128xf32>
    %42 = arith.truncf %41 : vector<16x128xf32> to vector<16x128xbf16>
    %43 = vector.extract_strided_slice %40 {offsets = [16, 0], sizes = [16, 128], strides = [1, 1]} : vector<32x128xf32> to vector<16x128xf32>
    %44 = arith.truncf %43 : vector<16x128xf32> to vector<16x128xbf16>
    %45 = tpu.concatenate %42, %44 in 1 : vector<16x128xbf16>, vector<16x128xbf16> -> vector<16x256xbf16>
    %c0_23 = arith.constant 0 : index
    %c0_24 = arith.constant 0 : index
    %46 = vector.load %arg4[%c0_23, %c0_24] : memref<256x128xbf16, #tpu.memory_space<vmem>>, vector<256x128xbf16>
    %cst_25 = arith.constant dense<0.000000e+00> : vector<16x128xf32>
    %47 = tpu.matmul %45, %46, %cst_25 {dimension_numbers = #tpu.dot_dimension_numbers<[1], [0], [0], [1], [0, 0, 1, 1], [], []>} : vector<16x256xbf16>, vector<256x128xbf16>, vector<16x128xf32> -> vector<16x128xf32>
    %48 = vector.extract_strided_slice %1 {offsets = [3, 0], sizes = [1, 128], strides = [1, 1]} : vector<4x128xf32> to vector<1x128xf32>
    %49 = vector.broadcast %48 : vector<1x128xf32> to vector<16x128xf32>
    %50 = arith.addf %47, %49 : vector<16x128xf32>
    %51 = vector.extract_strided_slice %50 {offsets = [0, 0], sizes = [8, 128], strides = [1, 1]} : vector<16x128xf32> to vector<8x128xf32>
    %52 = vector.extract_strided_slice %50 {offsets = [8, 0], sizes = [8, 128], strides = [1, 1]} : vector<16x128xf32> to vector<8x128xf32>
    %53 = arith.subf %51, %52 : vector<8x128xf32>
    %54 = math.absf %53 : vector<8x128xf32>
    %55 = arith.truncf %51 : vector<8x128xf32> to vector<8x128xbf16>
    %56 = arith.truncf %52 : vector<8x128xf32> to vector<8x128xbf16>
    %57 = arith.truncf %54 : vector<8x128xf32> to vector<8x128xbf16>
    %58 = tpu.concatenate %55, %56, %57 in 1 : vector<8x128xbf16>, vector<8x128xbf16>, vector<8x128xbf16> -> vector<8x384xbf16>
    %c0_26 = arith.constant 0 : index
    %c0_27 = arith.constant 0 : index
    %59 = vector.load %arg5[%c0_26, %c0_27] : memref<384x128xbf16, #tpu.memory_space<vmem>>, vector<384x128xbf16>
    %cst_28 = arith.constant dense<0.000000e+00> : vector<8x128xf32>
    %60 = tpu.matmul %58, %59, %cst_28 {dimension_numbers = #tpu.dot_dimension_numbers<[1], [0], [0], [1], [0, 0, 1, 1], [], []>} : vector<8x384xbf16>, vector<384x128xbf16>, vector<8x128xf32> -> vector<8x128xf32>
    %c0_29 = arith.constant 0 : index
    %c0_30 = arith.constant 0 : index
    %61 = vector.load %arg7[%c0_29, %c0_30] : memref<1x128xf32, #tpu.memory_space<vmem>>, vector<1x128xf32>
    %62 = vector.broadcast %61 : vector<1x128xf32> to vector<8x128xf32>
    %63 = arith.addf %60, %62 : vector<8x128xf32>
    %c0_31 = arith.constant 0 : index
    %c0_32 = arith.constant 0 : index
    %64 = vector.load %arg8[%c0_31, %c0_32] : memref<8x128xf32, #tpu.memory_space<vmem>>, vector<8x128xf32>
    tpu.vector_store %arg8[%c0_31, %c0_32], %63 {strides = array<i32>} : memref<8x128xf32, #tpu.memory_space<vmem>>, vector<8x128xf32>,
    return
  }
}

</mosaic_0001>

<bundles_post_ra>
// kernel: cre_gnn_forward.1
= control target key start
LH: loop header
LB: loop body
LE: loop exit
PB: predicated region body
PF: predicated region fallthrough
CT: control target
= control target key end

     0   :  { %13 = vsyncpa [#allocation3], 0  ;;  %s2900_s0 = inlined_call_operand.hbm [shape: bf16[128,128], index: 0, kind: input, shape index: {}]   ;;  %s2901_s1 = inlined_call_operand.hbm [shape: bf16[128,128], index: 1, kind: input, shape index: {}]   ;;  %s2902_s2 = inlined_call_operand.hbm [shape: bf16[32,128], index: 2, kind: input, shape index: {}]   ;;  %s2903_s3 = inlined_call_operand.hbm [shape: bf16[3,256,128], index: 3, kind: input, shape index: {}]   ;;  %s2904_s4 = inlined_call_operand.hbm [shape: bf16[256,128], index: 4, kind: input, shape index: {}]   ;;  %s2905_s5 = inlined_call_operand.hbm [shape: bf16[384,128], index: 5, kind: input, shape index: {}]   ;;  %s2906_s6 = inlined_call_operand.vmem [shape: f32[4,128], index: 6, kind: input, shape index: {}]   ;;  %s2907_s7 = inlined_call_operand.vmem [shape: f32[1,128], index: 7, kind: input, shape index: {}]   ;;  %s2908_s8 = inlined_call_operand.vmem [shape: f32[8,128], index: 8, kind: output, shape index: {}]  }
   0x1   :  { %14 = vsyncpa [#allocation5], 0 }
   0x2   :  { %15 = vsyncpa [#allocation8], 0 }
   0x3   :  { %16 = vsyncpa [#allocation11], 0  ;;  %s34_s29 = sshll.u32 %s2901_s1, 4  ;;  %s2628_s30 = smov [#allocation4]   ;;  %s35_s29 = int_to_ptr.hbm [resolvable:$true] %s34_s29 }
   0x4   :  { %s36_s9 = sshll.u32 %s2628_s30, 4  ;;  %s60_s12 = sshll.u32 %s2903_s3, 4  ;;  %s37_s9 = int_to_ptr.vmem [resolvable:$true] %s36_s9  ;;  %s61_s12 = int_to_ptr.hbm [resolvable:$true] %s60_s12 }
   0x5   :  { %s2629_s13 = smov 64   ;;  %s2630_s14 = smov 4  }
   0x6   :  { %42 = dma.hbm_to_vmem [thread:$0]  %s35_s29, 1024, %s37_s9, [#allocation5], %s2629_s13, %s2629_s13, %s2630_s14  }
   0x7   :  { %s2631_s15 = smov [#allocation7]   ;;  %s21_s1 = sshll.u32 %s2900_s0, 4  ;;  %s22_s1 = int_to_ptr.hbm [resolvable:$true] %s21_s1 }
   0x8   :  { %s62_s16 = sshll.u32 %s2631_s15, 4  ;;  %s47_s20 = sshll.u32 %s2902_s2, 4  ;;  %s63_s16 = int_to_ptr.vmem [resolvable:$true] %s62_s16  ;;  %s48_s20 = int_to_ptr.hbm [resolvable:$true] %s47_s20 }
   0x9   :  { %68 = dma.hbm_to_vmem [thread:$0]  %s61_s12, 6144, %s63_s16, [#allocation8], %s2629_s13, %s2629_s13, %s2630_s14  }
   0xa   :  { %s2632_s21 = smov [#allocation2]   ;;  %s2633_s23 = smov [#allocation6]  }
   0xb   :  { %s23_s22 = sshll.u32 %s2632_s21, 4  ;;  %s49_s0 = sshll.u32 %s2633_s23, 4  ;;  %s24_s22 = int_to_ptr.vmem [resolvable:$true] %s23_s22  ;;  %s50_s0 = int_to_ptr.vmem [resolvable:$true] %s49_s0 }
   0xc   :  { %29 = dma.hbm_to_vmem [thread:$0]  %s22_s1, 1024, %s24_s22, [#allocation3], %s2629_s13, %s2629_s13, %s2630_s14  }
   0xd   :  { %s73_s26 = sshll.u32 %s2904_s4, 4  ;;  %s86_s28 = sshll.u32 %s2905_s5, 4  ;;  %s74_s26 = int_to_ptr.hbm [resolvable:$true] %s73_s26  ;;  %s87_s28 = int_to_ptr.hbm [resolvable:$true] %s86_s28 }
   0xe   :  { %55 = dma.hbm_to_vmem [thread:$0]  %s48_s20, 256, %s50_s0, [#allocation5], %s2629_s13, %s2629_s13, %s2630_s14  }
   0xf   :  { %s2634_s29 = smov [#allocation9]   ;;  %s2635_s9 = smov [#allocation10]  }
  0x10   :  { %s75_s30 = sshll.u32 %s2634_s29, 4  ;;  %s88_s4 = sshll.u32 %s2635_s9, 4  ;;  %s76_s30 = int_to_ptr.vmem [resolvable:$true] %s75_s30  ;;  %s89_s4 = int_to_ptr.vmem [resolvable:$true] %s88_s4 }
  0x11   :  { %81 = dma.hbm_to_vmem [thread:$0]  %s74_s26, 2048, %s76_s30, [#allocation8], %s2629_s13, %s2629_s13, %s2630_s14  }
  0x12   :  { %94 = dma.hbm_to_vmem [thread:$0]  %s87_s28, 3072, %s89_s4, [#allocation11], %s2629_s13, %s2629_s13, %s2630_s14  }
  0x13   :  { %2620 = dma.done.wait [#allocation3], 1024  }
  0x14   :  { %2621 = vsyncadd [#allocation3], 4294966272 }
  0x15   :  { %2622 = dma.done.wait [#allocation5], 1280  }
  0x16   :  { %2623 = vsyncadd [#allocation5], 4294966016 }
  0x17   :  { %2624 = dma.done.wait [#allocation8], 8192  }
  0x18   :  { %2625 = vsyncadd [#allocation8], 4294959104 }
  0x19   :  { %2626 = dma.done.wait [#allocation11], 3072  }
  0x1a   :  { %2627 = vsyncadd [#allocation11], 4294964224  ;;  %v2717_v0 = vld [vmem:[#allocation2 + $0x38] sm:$0xff]  ;;  %v2720_v1 = vld [vmem:[#allocation2 + $0x30] sm:$0xff] }
  0x1b   :  { %252 = vmatpush.bf16.msra.mxu0 %v2717_v0  ;;  %2445 = vmatpush.bf16.msra.mxu1 %v2717_v0  ;;  %v2725_v2 = vld [vmem:[#allocation2 + $0x28] sm:$0xff]  ;;  %v2730_v3 = vld [vmem:[#allocation2 + $0x20] sm:$0xff]  ;;  %v2735_v4 = vld [vmem:[#allocation2 + $0x18] sm:$0xff] }
  0x1c   :  { %2446 = vmatpush.bf16.msra.mxu2 %v2717_v0  ;;  %v2740_v5 = vld [vmem:[#allocation2 + $0x10] sm:$0xff]  ;;  %v2348_v6 = vld [vmem:[#allocation2 + $0x8] sm:$0xff]  ;;  %v2347_v7 = vld [vmem:[#allocation2] sm:$0xff] }
  0x1d   :  { %v2747_v8 = vld [vmem:[#allocation4] sm:$0xff]  ;;  %v2750_v9 = vld [vmem:[#allocation4 + $0x8] sm:$0xff]  ;;  %v2753_v10 = vld [vmem:[#allocation4 + $0x10] sm:$0xff] }
  0x1e   :  { %v2756_v11 = vld [vmem:[#allocation4 + $0x28] sm:$0xff]  ;;  %v2758_v13 = vld [vmem:[#allocation4 + $0x38] sm:$0xff]  ;;  %v2369_v14 = vld [vmem:[#allocation7 + $0x70] sm:$0xff] }
  0x1f   :  { %253 = vmatpush.bf16.msra.mxu0 %v2720_v1  ;;  %2447 = vmatpush.bf16.msra.mxu1 %v2720_v1  ;;  %v2370_v12 = vld [vmem:[#allocation7 + $0x78] sm:$0xff]  ;;  %v2361_v16 = vld [vmem:[#allocation7 + $0x30] sm:$0xff]  ;;  %v2368_v17 = vld [vmem:[#allocation7 + $0x68] sm:$0xff] }
  0x20   :  { %2448 = vmatpush.bf16.msra.mxu2 %v2720_v1  ;;  %v2362_v15 = vld [vmem:[#allocation7 + $0x38] sm:$0xff]  ;;  %v2360_v18 = vld [vmem:[#allocation7 + $0x28] sm:$0xff]  ;;  %v2367_v19 = vld [vmem:[#allocation7 + $0x60] sm:$0xff] }
  0x21   :  { %v2762_v20 = vld [vmem:[#allocation4 + $0x18] sm:$0xff]  ;;  %v2359_v21 = vld [vmem:[#allocation7 + $0x20] sm:$0xff]  ;;  %v2366_v23 = vld [vmem:[#allocation7 + $0x58] sm:$0xff] }
  0x22   :  { %v2764_v22 = vld [vmem:[#allocation4 + $0x30] sm:$0xff]  ;;  %v2365_v24 = vld [vmem:[#allocation7 + $0x50] sm:$0xff]  ;;  %v2364_v25 = vld [vmem:[#allocation7 + $0x48] sm:$0xff] }
  0x23   :  { %254 = vmatpush.bf16.msra.mxu0 %v2725_v2  ;;  %2449 = vmatpush.bf16.msra.mxu1 %v2725_v2  ;;  %v2768_v26 = vld [vmem:[#allocation4 + $0x20] sm:$0xff]  ;;  %v2358_v27 = vld [vmem:[#allocation7 + $0x18] sm:$0xff]  ;;  %v2363_v28 = vld [vmem:[#allocation7 + $0x40] sm:$0xff] }
  0x24   :  { %2450 = vmatpush.bf16.msra.mxu2 %v2725_v2  ;;  %v2357_v29 = vld [vmem:[#allocation7 + $0x10] sm:$0xff]  ;;  %v2356_v30 = vld [vmem:[#allocation7 + $0x8] sm:$0xff]  ;;  %v2355_v31 = vld [vmem:[#allocation7] sm:$0xff] }
  0x27   :  { %255 = vmatpush.bf16.msra.mxu0 %v2730_v3  ;;  %2451 = vmatpush.bf16.msra.mxu1 %v2730_v3 }
  0x28   :  { %2452 = vmatpush.bf16.msra.mxu2 %v2730_v3 }
  0x2b   :  { %256 = vmatpush.bf16.msra.mxu0 %v2735_v4  ;;  %2453 = vmatpush.bf16.msra.mxu1 %v2735_v4 }
  0x2c   :  { %2454 = vmatpush.bf16.msra.mxu2 %v2735_v4 }
  0x2f   :  { %257 = vmatpush.bf16.msra.mxu0 %v2740_v5  ;;  %2455 = vmatpush.bf16.msra.mxu1 %v2740_v5 }
  0x30   :  { %2456 = vmatpush.bf16.msra.mxu2 %v2740_v5 }
  0x33   :  { %258 = vmatpush.bf16.msra.mxu0 %v2348_v6  ;;  %2457 = vmatpush.bf16.msra.mxu1 %v2348_v6 }
  0x34   :  { %2458 = vmatpush.bf16.msra.mxu2 %v2348_v6 }
  0x37   :  { %259 = vmatpush.bf16.msra.mxu0 %v2347_v7  ;;  %2459 = vmatpush.bf16.msra.mxu1 %v2347_v7 }
  0x38   :  { %2460 = vmatpush.bf16.msra.mxu2 %v2347_v7 }
  0x3a   :  { %260 = vmatmul.bf16.vlgmr.msra.gmra.mxu0 %v2747_v8  ;;  %285 = vmatmul.bf16.vlgmr.msra.gmra.mxu1 %v2756_v11 }
  0x3b   :  { %295 = vmatmul.bf16.vlgmr.msra.gmra.mxu2 %v2758_v13  ;;  %494 = vmatpush.bf16.msrb.mxu1 %v2362_v15 }
  0x3c   :  { %543 = vmatpush.bf16.msrb.mxu2 %v2370_v12 }
  0x3f   :  { %495 = vmatpush.bf16.msrb.mxu1 %v2361_v16 }
  0x40   :  { %544 = vmatpush.bf16.msrb.mxu2 %v2369_v14 }
  0x43   :  { %496 = vmatpush.bf16.msrb.mxu1 %v2360_v18 }
  0x44   :  { %545 = vmatpush.bf16.msrb.mxu2 %v2368_v17 }
  0x47   :  { %497 = vmatpush.bf16.msrb.mxu1 %v2359_v21 }
  0x48   :  { %546 = vmatpush.bf16.msrb.mxu2 %v2367_v19  ;;  %v2385_v19 = vld [vmem:[#allocation7 + $0xf0] sm:$0xff] }
  0x4a   :  { %265 = vmatmul.bf16.gmra.mxu0 %v2750_v9  ;;  %290 = vmatmul.bf16.gmra.mxu1 %v2764_v22 }
  0x4b   :  { %498 = vmatpush.bf16.msrb.mxu1 %v2358_v27 }
  0x4c   :  { %547 = vmatpush.bf16.msrb.mxu2 %v2366_v23 }
  0x4f   :  { %499 = vmatpush.bf16.msrb.mxu1 %v2357_v29 }
  0x50   :  { %548 = vmatpush.bf16.msrb.mxu2 %v2365_v24 }
  0x53   :  { %500 = vmatpush.bf16.msrb.mxu1 %v2356_v30 }
  0x54   :  { %549 = vmatpush.bf16.msrb.mxu2 %v2364_v25  ;;  %v2384_v25 = vld [vmem:[#allocation7 + $0xe8] sm:$0xff] }
  0x57   :  { %501 = vmatpush.bf16.msrb.mxu1 %v2355_v31 }
  0x58   :  { %550 = vmatpush.bf16.msrb.mxu2 %v2363_v28 }
  0x5a   :  { %270 = vmatmul.bf16.gmra.mxu0 %v2753_v10 }
  0x5b   :  { %551 = vmatmul.bf16.vlgmr.msrb.gmra.mxu2 %v2347_v7 }
  0x6a   :  { %275 = vmatmul.bf16.gmra.mxu0 %v2762_v20 }
  0x6b   :  { %556 = vmatmul.bf16.gmra.mxu2 %v2348_v6 }
  0x7a   :  { %280 = vmatmul.bf16.gmra.mxu0 %v2768_v26 }
  0x7b   :  { %561 = vmatmul.bf16.gmra.mxu2 %v2740_v5 }
  0x8b   :  { %566 = vmatmul.bf16.gmra.mxu2 %v2735_v4 }
  0x9b   :  { %571 = vmatmul.bf16.gmra.mxu2 %v2730_v3 }
  0xab   :  { %576 = vmatmul.bf16.gmra.mxu2 %v2725_v2 }
  0xb7   :  { %v261_v32 = vpop.f32.mrf.mxu0  ;;  %v286_v61 = vpop.f32.mrf.mxu1 }
  0xb8   :  { %v301_v33 = vpack.c.bf16 %v261_v32, %v261_v32  ;;  %v311_v2 = vpack.c.bf16 %v286_v61, %v286_v61  ;;  %v2382_v32 = vld [vmem:[#allocation7 + $0xd8] sm:$0xff] }
  0xba   :  { %v333_v36 = vunpack.c.l.b16 %v301_v33  ;;  %v343_v15 = vunpack.c.l.b16 %v311_v2  ;;  %v2381_v33 = vld [vmem:[#allocation7 + $0xd0] sm:$0xff] }
  0xbb   :  { %581 = vmatmul.bf16.gmra.mxu2 %v2720_v1  ;;  %v2386_v1 = vld [vmem:[#allocation7 + $0xf8] sm:$0xff] }
  0xbc   :  { %964 = vmatpush.bf16.msra.mxu1 %v2386_v1 }
  0xbe   :  { %v296_v18 = vpop.f32.mrf.mxu2 }
  0xbf   :  { %v263_v34 = vpop.f32.mrf.mxu0  ;;  %v288_v7 = vpop.f32.mrf.mxu1 }
  0xc0   :  { %v302_v35 = vpack.c.bf16 %v263_v34, %v263_v34  ;;  %v312_v12 = vpack.c.bf16 %v288_v7, %v288_v7  ;;  %965 = vmatpush.bf16.msra.mxu1 %v2385_v19  ;;  %v315_v34 = vpack.c.bf16 %v296_v18, %v296_v18 }
  0xc2   :  { %v334_v37 = vunpack.c.l.b16 %v302_v35  ;;  %v344_v16 = vunpack.c.l.b16 %v312_v12 }
  0xc4   :  { %v349_v38 = vpack.c.b16 %v334_v37, %v333_v36  ;;  %v354_v17 = vpack.c.b16 %v344_v16, %v343_v15  ;;  %966 = vmatpush.bf16.msra.mxu1 %v2384_v25  ;;  %v2380_v36 = vld [vmem:[#allocation7 + $0xc8] sm:$0xff]  ;;  %v347_v37 = vunpack.c.l.b16 %v315_v34 }
  0xc6   :  { %502 = vmatmul.bf16.vlgmr.msrb.gmra.mxu1 %v349_v38  ;;  %v298_v27 = vpop.f32.mrf.mxu2 }
  0xc7   :  { %v266_v39 = vpop.f32.mrf.mxu0  ;;  %v291_v14 = vpop.f32.mrf.mxu1  ;;  %v316_v35 = vpack.c.bf16 %v298_v27, %v298_v27 }
  0xc8   :  { %v303_v40 = vpack.c.bf16 %v266_v39, %v266_v39  ;;  %v313_v23 = vpack.c.bf16 %v291_v14, %v291_v14 }
  0xc9   :  { %v348_v38 = vunpack.c.l.b16 %v316_v35 }
  0xca   :  { %v335_v43 = vunpack.c.l.b16 %v303_v40  ;;  %v345_v28 = vunpack.c.l.b16 %v313_v23  ;;  %v2379_v40 = vld [vmem:[#allocation7 + $0xc0] sm:$0xff] }
  0xcb   :  { %586 = vmatmul.bf16.gmra.mxu2 %v2717_v0  ;;  %v2383_v0 = vld [vmem:[#allocation7 + $0xe0] sm:$0xff] }
  0xcc   :  { %967 = vmatpush.bf16.msra.mxu1 %v2383_v0 }
  0xcf   :  { %v268_v41 = vpop.f32.mrf.mxu0  ;;  %v293_v21 = vpop.f32.mrf.mxu1 }
  0xd0   :  { %v304_v42 = vpack.c.bf16 %v268_v41, %v268_v41  ;;  %v314_v24 = vpack.c.bf16 %v293_v21, %v293_v21  ;;  %968 = vmatpush.bf16.msra.mxu1 %v2382_v32  ;;  %v356_v41 = vpack.c.b16 %v348_v38, %v347_v37 }
  0xd2   :  { %v336_v44 = vunpack.c.l.b16 %v304_v42  ;;  %v346_v29 = vunpack.c.l.b16 %v314_v24 }
  0xd4   :  { %v350_v45 = vpack.c.b16 %v336_v44, %v335_v43  ;;  %v355_v30 = vpack.c.b16 %v346_v29, %v345_v28  ;;  %969 = vmatpush.bf16.msra.mxu1 %v2381_v33  ;;  %v2780_v43 = vld [vmem:[%s2906_s6] sm:$0xf] }
  0xd5   :  { %v2783_v44 = vperm.slane %v2780_v43, 0 }
  0xd6   :  { %507 = vmatmul.bf16.gmra.mxu1 %v350_v45 }
  0xd7   :  { %v271_v46 = vpop.f32.mrf.mxu0 }
  0xd8   :  { %v305_v47 = vpack.c.bf16 %v271_v46, %v271_v46  ;;  %970 = vmatpush.bf16.msra.mxu1 %v2380_v36 }
  0xda   :  { %v337_v50 = vunpack.c.l.b16 %v305_v47 }
  0xdc   :  { %971 = vmatpush.bf16.msra.mxu1 %v2379_v40 }
  0xde   :  { %v552_v31 = vpop.f32.mrf.mxu2 }
  0xdf   :  { %v273_v48 = vpop.f32.mrf.mxu0 }
  0xe0   :  { %v306_v49 = vpack.c.bf16 %v273_v48, %v273_v48 }
  0xe2   :  { %v338_v51 = vunpack.c.l.b16 %v306_v49 }
  0xe4   :  { %v351_v52 = vpack.c.b16 %v338_v51, %v337_v50 }
  0xe6   :  { %512 = vmatmul.bf16.gmra.mxu1 %v351_v52  ;;  %v554_v39 = vpop.f32.mrf.mxu2 }
  0xe7   :  { %v276_v53 = vpop.f32.mrf.mxu0 }
  0xe8   :  { %v307_v54 = vpack.c.bf16 %v276_v53, %v276_v53 }
  0xea   :  { %v339_v57 = vunpack.c.l.b16 %v307_v54 }
  0xee   :  { %v557_v42 = vpop.f32.mrf.mxu2 }
  0xef   :  { %v278_v55 = vpop.f32.mrf.mxu0 }
  0xf0   :  { %v308_v56 = vpack.c.bf16 %v278_v55, %v278_v55 }
  0xf2   :  { %v340_v58 = vunpack.c.l.b16 %v308_v56 }
  0xf4   :  { %v352_v59 = vpack.c.b16 %v340_v58, %v339_v57 }
  0xf6   :  { %517 = vmatmul.bf16.gmra.mxu1 %v352_v59  ;;  %v559_v47 = vpop.f32.mrf.mxu2 }
  0xf7   :  { %v281_v60 = vpop.f32.mrf.mxu0 }
  0xf8   :  { %v309_v62 = vpack.c.bf16 %v281_v60, %v281_v60 }
  0xfa   :  { %v341_v4 = vunpack.c.l.b16 %v309_v62 }
  0xfe   :  { %v562_v53 = vpop.f32.mrf.mxu2 }
  0xff   :  { %v283_v63 = vpop.f32.mrf.mxu0 }
 0x100   :  { %v310_v3 = vpack.c.bf16 %v283_v63, %v283_v63 }
 0x102   :  { %v342_v5 = vunpack.c.l.b16 %v310_v3 }
 0x104   :  { %v353_v6 = vpack.c.b16 %v342_v5, %v341_v4 }
 0x106   :  { %522 = vmatmul.bf16.gmra.mxu1 %v353_v6  ;;  %v564_v63 = vpop.f32.mrf.mxu2 }
 0x10e   :  { %v567_v15 = vpop.f32.mrf.mxu2 }
 0x116   :  { %527 = vmatmul.bf16.gmra.mxu1 %v354_v17  ;;  %v569_v25 = vpop.f32.mrf.mxu2 }
 0x11e   :  { %v572_v35 = vpop.f32.mrf.mxu2 }
 0x126   :  { %532 = vmatmul.bf16.gmra.mxu1 %v355_v30 }
 0x136   :  { %537 = vmatmul.bf16.gmra.mxu1 %v356_v41 }
 0x143   :  { %v503_v45 = vpop.f32.mrf.mxu1 }
 0x144   :  { %v504_v46 = vadd.f32 %v503_v45, %v2783_v44  ;;  %v574_v45 = vpop.f32.mrf.mxu2 }
 0x146   :  { %v553_v48 = vadd.f32 %v552_v31, %v504_v46 }
 0x148   :  { %v592_v50 = vmax.f32 %v553_v48, 0.0 }
 0x14a   :  { %v608_v54 = vpack.c.bf16 %v592_v50, %v592_v50 }
 0x14b   :  { %v505_v49 = vpop.f32.mrf.mxu1 }
 0x14c   :  { %v506_v51 = vadd.f32 %v505_v49, %v2783_v44  ;;  %v640_v58 = vunpack.c.l.b16 %v608_v54  ;;  %v577_v54 = vpop.f32.mrf.mxu2 }
 0x14e   :  { %v555_v52 = vadd.f32 %v554_v39, %v506_v51 }
 0x150   :  { %v593_v55 = vmax.f32 %v555_v52, 0.0 }
 0x152   :  { %v609_v56 = vpack.c.bf16 %v593_v55, %v593_v55 }
 0x153   :  { %v508_v57 = vpop.f32.mrf.mxu1 }
 0x154   :  { %v641_v59 = vunpack.c.l.b16 %v609_v56  ;;  %v509_v60 = vadd.f32 %v508_v57, %v2783_v44 }
 0x156   :  { %v2788_v61 = vpack.c.b16 %v641_v59, %v640_v58  ;;  %v558_v62 = vadd.f32 %v557_v42, %v509_v60 }
 0x158   :  { %972 = vmatmul.bf16.vlgmr.msra.gmra.mxu1 %v2788_v61  ;;  %v594_v4 = vmax.f32 %v558_v62, 0.0 }
 0x15a   :  { %v610_v7 = vpack.c.bf16 %v594_v4, %v594_v4 }
 0x15b   :  { %v510_v3 = vpop.f32.mrf.mxu1 }
 0x15c   :  { %v511_v5 = vadd.f32 %v510_v3, %v2783_v44  ;;  %v642_v17 = vunpack.c.l.b16 %v610_v7 }
 0x15e   :  { %v560_v6 = vadd.f32 %v559_v47, %v511_v5  ;;  %v579_v5 = vpop.f32.mrf.mxu2 }
 0x160   :  { %v595_v2 = vmax.f32 %v560_v6, 0.0 }
 0x162   :  { %v611_v12 = vpack.c.bf16 %v595_v2, %v595_v2 }
 0x163   :  { %v513_v14 = vpop.f32.mrf.mxu1 }
 0x164   :  { %v514_v16 = vadd.f32 %v513_v14, %v2783_v44  ;;  %v643_v18 = vunpack.c.l.b16 %v611_v12 }
 0x166   :  { %v2793_v1 = vpack.c.b16 %v643_v18, %v642_v17  ;;  %v563_v19 = vadd.f32 %v562_v53, %v514_v16  ;;  %v582_v16 = vpop.f32.mrf.mxu2 }
 0x168   :  { %977 = vmatmul.bf16.gmra.mxu1 %v2793_v1  ;;  %v596_v23 = vmax.f32 %v563_v19, 0.0 }
 0x16a   :  { %v612_v28 = vpack.c.bf16 %v596_v23, %v596_v23 }
 0x16b   :  { %v515_v21 = vpop.f32.mrf.mxu1 }
 0x16c   :  { %v516_v24 = vadd.f32 %v515_v21, %v2783_v44  ;;  %v644_v31 = vunpack.c.l.b16 %v612_v28 }
 0x16e   :  { %v565_v27 = vadd.f32 %v564_v63, %v516_v24 }
 0x170   :  { %v597_v29 = vmax.f32 %v565_v27, 0.0 }
 0x172   :  { %v613_v0 = vpack.c.bf16 %v597_v29, %v597_v29  ;;  %v584_v29 = vpop.f32.mrf.mxu2 }
 0x173   :  { %v518_v30 = vpop.f32.mrf.mxu1 }
 0x174   :  { %v645_v32 = vunpack.c.l.b16 %v613_v0  ;;  %v519_v33 = vadd.f32 %v518_v30, %v2783_v44 }
 0x176   :  { %v2798_v34 = vpack.c.b16 %v645_v32, %v644_v31  ;;  %v568_v36 = vadd.f32 %v567_v15, %v519_v33 }
 0x178   :  { %982 = vmatmul.bf16.gmra.mxu1 %v2798_v34  ;;  %v598_v38 = vmax.f32 %v568_v36, 0.0 }
 0x17a   :  { %v614_v41 = vpack.c.bf16 %v598_v38, %v598_v38 }
 0x17b   :  { %v520_v37 = vpop.f32.mrf.mxu1 }
 0x17c   :  { %v521_v39 = vadd.f32 %v520_v37, %v2783_v44  ;;  %v646_v48 = vunpack.c.l.b16 %v614_v41  ;;  %v587_v37 = vpop.f32.mrf.mxu2 }
 0x17e   :  { %v570_v40 = vadd.f32 %v569_v25, %v521_v39 }
 0x180   :  { %v599_v42 = vmax.f32 %v570_v40, 0.0 }
 0x182   :  { %v615_v46 = vpack.c.bf16 %v599_v42, %v599_v42 }
 0x183   :  { %v523_v47 = vpop.f32.mrf.mxu1 }
 0x184   :  { %v647_v49 = vunpack.c.l.b16 %v615_v46  ;;  %v524_v50 = vadd.f32 %v523_v47, %v2783_v44 }
 0x186   :  { %v2803_v51 = vpack.c.b16 %v647_v49, %v646_v48  ;;  %v573_v52 = vadd.f32 %v572_v35, %v524_v50  ;;  %v589_v49 = vpop.f32.mrf.mxu2 }
 0x188   :  { %987 = vmatmul.bf16.gmra.mxu1 %v2803_v51  ;;  %v600_v55 = vmax.f32 %v573_v52, 0.0 }
 0x18a   :  { %v616_v58 = vpack.c.bf16 %v600_v55, %v600_v55 }
 0x18b   :  { %v525_v53 = vpop.f32.mrf.mxu1 }
 0x18c   :  { %v526_v56 = vadd.f32 %v525_v53, %v2783_v44  ;;  %v648_v63 = vunpack.c.l.b16 %v616_v58 }
 0x18e   :  { %v575_v57 = vadd.f32 %v574_v45, %v526_v56 }
 0x190   :  { %v601_v59 = vmax.f32 %v575_v57, 0.0 }
 0x192   :  { %v617_v60 = vpack.c.bf16 %v601_v59, %v601_v59 }
 0x193   :  { %v528_v62 = vpop.f32.mrf.mxu1 }
 0x194   :  { %v649_v3 = vunpack.c.l.b16 %v617_v60  ;;  %v529_v4 = vadd.f32 %v528_v62, %v2783_v44 }
 0x196   :  { %v660_v6 = vpack.c.b16 %v649_v3, %v648_v63  ;;  %v578_v7 = vadd.f32 %v577_v54, %v529_v4 }
 0x198   :  { %992 = vmatmul.bf16.gmra.mxu1 %v660_v6  ;;  %v602_v12 = vmax.f32 %v578_v7, 0.0 }
 0x19a   :  { %v618_v17 = vpack.c.bf16 %v602_v12, %v602_v12 }
 0x19b   :  { %v530_v2 = vpop.f32.mrf.mxu1 }
 0x19c   :  { %v531_v14 = vadd.f32 %v530_v2, %v2783_v44  ;;  %v650_v23 = vunpack.c.l.b16 %v618_v17 }
 0x19e   :  { %v580_v15 = vadd.f32 %v579_v5, %v531_v14 }
 0x1a0   :  { %v603_v18 = vmax.f32 %v580_v15, 0.0 }
 0x1a2   :  { %v619_v19 = vpack.c.bf16 %v603_v18, %v603_v18 }
 0x1a3   :  { %v533_v21 = vpop.f32.mrf.mxu1 }
 0x1a4   :  { %v651_v24 = vunpack.c.l.b16 %v619_v19  ;;  %v534_v25 = vadd.f32 %v533_v21, %v2783_v44 }
 0x1a6   :  { %v661_v27 = vpack.c.b16 %v651_v24, %v650_v23  ;;  %v583_v28 = vadd.f32 %v582_v16, %v534_v25 }
 0x1a8   :  { %997 = vmatmul.bf16.gmra.mxu1 %v661_v27  ;;  %v604_v30 = vmax.f32 %v583_v28, 0.0 }
 0x1aa   :  { %v620_v33 = vpack.c.bf16 %v604_v30, %v604_v30 }
 0x1ab   :  { %v535_v0 = vpop.f32.mrf.mxu1 }
 0x1ac   :  { %v536_v31 = vadd.f32 %v535_v0, %v2783_v44  ;;  %v652_v39 = vunpack.c.l.b16 %v620_v33 }
 0x1ae   :  { %v585_v32 = vadd.f32 %v584_v29, %v536_v31 }
 0x1b0   :  { %v605_v35 = vmax.f32 %v585_v32, 0.0 }
 0x1b2   :  { %v621_v36 = vpack.c.bf16 %v605_v35, %v605_v35 }
 0x1b3   :  { %v538_v38 = vpop.f32.mrf.mxu1 }
 0x1b4   :  { %v653_v40 = vunpack.c.l.b16 %v621_v36  ;;  %v539_v41 = vadd.f32 %v538_v38, %v2783_v44 }
 0x1b6   :  { %v662_v42 = vpack.c.b16 %v653_v40, %v652_v39  ;;  %v588_v45 = vadd.f32 %v587_v37, %v539_v41 }
 0x1b8   :  { %1002 = vmatmul.bf16.gmra.mxu1 %v662_v42  ;;  %v606_v47 = vmax.f32 %v588_v45, 0.0 }
 0x1ba   :  { %v622_v52 = vpack.c.bf16 %v606_v47, %v606_v47  ;;  %v2402_v47 = vld [vmem:[#allocation7 + $0x178] sm:$0xff] }
 0x1bb   :  { %v540_v46 = vpop.f32.mrf.mxu1 }
 0x1bc   :  { %v541_v48 = vadd.f32 %v540_v46, %v2783_v44  ;;  %v654_v55 = vunpack.c.l.b16 %v622_v52  ;;  %v2378_v44 = vld [vmem:[#allocation7 + $0xb8] sm:$0xff] }
 0x1bd   :  { %915 = vmatpush.bf16.msrb.mxu0 %v2378_v44 }
 0x1be   :  { %v590_v50 = vadd.f32 %v589_v49, %v541_v48  ;;  %v2401_v49 = vld [vmem:[#allocation7 + $0x170] sm:$0xff] }
 0x1c0   :  { %v607_v53 = vmax.f32 %v590_v50, 0.0  ;;  %v2400_v50 = vld [vmem:[#allocation7 + $0x168] sm:$0xff] }
 0x1c2   :  { %v623_v54 = vpack.c.bf16 %v607_v53, %v607_v53 }
 0x1c4   :  { %v655_v56 = vunpack.c.l.b16 %v623_v54 }
 0x1c6   :  { %v663_v57 = vpack.c.b16 %v655_v56, %v654_v55 }
 0x1c8   :  { %672 = vmatpush.bf16.msra.mxu3 %v663_v57  ;;  %1007 = vmatmul.bf16.gmra.mxu1 %v663_v57  ;;  %v2399_v57 = vld [vmem:[#allocation7 + $0x160] sm:$0xff] }
 0x1cc   :  { %673 = vmatpush.bf16.msra.mxu3 %v662_v42 }
 0x1d0   :  { %674 = vmatpush.bf16.msra.mxu3 %v661_v27 }
 0x1d4   :  { %675 = vmatpush.bf16.msra.mxu3 %v660_v6 }
 0x1d8   :  { %676 = vmatpush.bf16.msra.mxu3 %v2803_v51  ;;  %v2377_v51 = vld [vmem:[#allocation7 + $0xb0] sm:$0xff] }
 0x1d9   :  { %916 = vmatpush.bf16.msrb.mxu0 %v2377_v51  ;;  %v973_v51 = vpop.f32.mrf.mxu1 }
 0x1dc   :  { %677 = vmatpush.bf16.msra.mxu3 %v2798_v34  ;;  %v2376_v34 = vld [vmem:[#allocation7 + $0xa8] sm:$0xff] }
 0x1dd   :  { %917 = vmatpush.bf16.msrb.mxu0 %v2376_v34 }
 0x1e0   :  { %678 = vmatpush.bf16.msra.mxu3 %v2793_v1  ;;  %v2375_v1 = vld [vmem:[#allocation7 + $0xa0] sm:$0xff] }
 0x1e1   :  { %918 = vmatpush.bf16.msrb.mxu0 %v2375_v1  ;;  %v2398_v1 = vld [vmem:[#allocation7 + $0x158] sm:$0xff] }
 0x1e4   :  { %679 = vmatpush.bf16.msra.mxu3 %v2788_v61  ;;  %v2371_v61 = vld [vmem:[#allocation7 + $0x80] sm:$0xff] }
 0x1e7   :  { %680 = vmatmul.bf16.vlgmr.msra.gmra.mxu3 %v2747_v8  ;;  %v2374_v8 = vld [vmem:[#allocation7 + $0x98] sm:$0xff] }
 0x1e8   :  { %919 = vmatpush.bf16.msrb.mxu0 %v2374_v8  ;;  %v2397_v8 = vld [vmem:[#allocation7 + $0x150] sm:$0xff] }
 0x1f7   :  { %685 = vmatmul.bf16.gmra.mxu3 %v2750_v9  ;;  %v2373_v9 = vld [vmem:[#allocation7 + $0x90] sm:$0xff] }
 0x1f8   :  { %920 = vmatpush.bf16.msrb.mxu0 %v2373_v9 }
 0x207   :  { %690 = vmatmul.bf16.gmra.mxu3 %v2753_v10  ;;  %v2372_v10 = vld [vmem:[#allocation7 + $0x88] sm:$0xff] }
 0x208   :  { %921 = vmatpush.bf16.msrb.mxu0 %v2372_v10 }
 0x20c   :  { %922 = vmatpush.bf16.msrb.mxu0 %v2371_v61  ;;  %v2396_v61 = vld [vmem:[#allocation7 + $0x148] sm:$0xff] }
 0x210   :  { %1385 = vmatpush.bf16.msra.mxu0 %v2402_v47 }
 0x214   :  { %1386 = vmatpush.bf16.msra.mxu0 %v2401_v49 }
 0x217   :  { %695 = vmatmul.bf16.gmra.mxu3 %v2762_v20 }
 0x218   :  { %1387 = vmatpush.bf16.msra.mxu0 %v2400_v50 }
 0x21c   :  { %1388 = vmatpush.bf16.msra.mxu0 %v2399_v57 }
 0x220   :  { %1389 = vmatpush.bf16.msra.mxu0 %v2398_v1 }
 0x224   :  { %1390 = vmatpush.bf16.msra.mxu0 %v2397_v8 }
 0x227   :  { %700 = vmatmul.bf16.gmra.mxu3 %v2768_v26 }
 0x228   :  { %1391 = vmatpush.bf16.msra.mxu0 %v2396_v61 }
 0x237   :  { %705 = vmatmul.bf16.gmra.mxu3 %v2756_v11 }
 0x247   :  { %710 = vmatmul.bf16.gmra.mxu3 %v2764_v22 }
 0x257   :  { %715 = vmatmul.bf16.gmra.mxu3 %v2758_v13 }
 0x26a   :  { %v681_v11 = vpop.f32.mrf.mxu3 }
 0x26b   :  { %v721_v58 = vpack.c.bf16 %v681_v11, %v681_v11 }
 0x26d   :  { %v753_v62 = vunpack.c.l.b16 %v721_v58  ;;  %v975_v58 = vpop.f32.mrf.mxu1 }
 0x272   :  { %v683_v59 = vpop.f32.mrf.mxu3 }
 0x273   :  { %v722_v60 = vpack.c.bf16 %v683_v59, %v683_v59 }
 0x275   :  { %v754_v63 = vunpack.c.l.b16 %v722_v60 }
 0x277   :  { %v769_v3 = vpack.c.b16 %v754_v63, %v753_v62  ;;  %v2395_v62 = vld [vmem:[#allocation7 + $0x140] sm:$0xff] }
 0x278   :  { %1392 = vmatpush.bf16.msra.mxu0 %v2395_v62 }
 0x279   :  { %923 = vmatmul.bf16.vlgmr.msrb.gmra.mxu0 %v769_v3  ;;  %v978_v3 = vpop.f32.mrf.mxu1 }
 0x27a   :  { %v686_v4 = vpop.f32.mrf.mxu3 }
 0x27b   :  { %v723_v5 = vpack.c.bf16 %v686_v4, %v686_v4  ;;  %v2826_v4 = vperm.slane %v2780_v43, 1 }
 0x27d   :  { %v755_v2 = vunpack.c.l.b16 %v723_v5 }
 0x282   :  { %v688_v6 = vpop.f32.mrf.mxu3 }
 0x283   :  { %v724_v7 = vpack.c.bf16 %v688_v6, %v688_v6 }
 0x285   :  { %v756_v12 = vunpack.c.l.b16 %v724_v7  ;;  %v980_v7 = vpop.f32.mrf.mxu1 }
 0x287   :  { %v770_v14 = vpack.c.b16 %v756_v12, %v755_v2 }
 0x289   :  { %928 = vmatmul.bf16.gmra.mxu0 %v770_v14 }
 0x28a   :  { %v691_v15 = vpop.f32.mrf.mxu3 }
 0x28b   :  { %v725_v16 = vpack.c.bf16 %v691_v15, %v691_v15 }
 0x28d   :  { %v757_v18 = vunpack.c.l.b16 %v725_v16 }
 0x292   :  { %v693_v17 = vpop.f32.mrf.mxu3 }
 0x293   :  { %v726_v13 = vpack.c.bf16 %v693_v17, %v693_v17  ;;  %v983_v17 = vpop.f32.mrf.mxu1 }
 0x295   :  { %v758_v19 = vunpack.c.l.b16 %v726_v13 }
 0x297   :  { %v771_v21 = vpack.c.b16 %v758_v19, %v757_v18 }
 0x299   :  { %933 = vmatmul.bf16.gmra.mxu0 %v771_v21 }
 0x29a   :  { %v696_v23 = vpop.f32.mrf.mxu3 }
 0x29b   :  { %v727_v24 = vpack.c.bf16 %v696_v23, %v696_v23 }
 0x29d   :  { %v759_v28 = vunpack.c.l.b16 %v727_v24 }
 0x2a2   :  { %v698_v25 = vpop.f32.mrf.mxu3 }
 0x2a3   :  { %v728_v27 = vpack.c.bf16 %v698_v25, %v698_v25 }
 0x2a5   :  { %v760_v29 = vunpack.c.l.b16 %v728_v27 }
 0x2a7   :  { %v772_v0 = vpack.c.b16 %v760_v29, %v759_v28  ;;  %v985_v29 = vpop.f32.mrf.mxu1 }
 0x2a9   :  { %938 = vmatmul.bf16.gmra.mxu0 %v772_v0 }
 0x2aa   :  { %v701_v30 = vpop.f32.mrf.mxu3 }
 0x2ab   :  { %v729_v31 = vpack.c.bf16 %v701_v30, %v701_v30 }
 0x2ad   :  { %v761_v35 = vunpack.c.l.b16 %v729_v31 }
 0x2b2   :  { %v703_v32 = vpop.f32.mrf.mxu3 }
 0x2b3   :  { %v730_v33 = vpack.c.bf16 %v703_v32, %v703_v32 }
 0x2b5   :  { %v762_v36 = vunpack.c.l.b16 %v730_v33 }
 0x2b7   :  { %v773_v37 = vpack.c.b16 %v762_v36, %v761_v35 }
 0x2b9   :  { %943 = vmatmul.bf16.gmra.mxu0 %v773_v37  ;;  %v988_v37 = vpop.f32.mrf.mxu1 }
 0x2ba   :  { %v706_v38 = vpop.f32.mrf.mxu3 }
 0x2bb   :  { %v731_v39 = vpack.c.bf16 %v706_v38, %v706_v38 }
 0x2bd   :  { %v763_v42 = vunpack.c.l.b16 %v731_v39 }
 0x2c1   :  { %v990_v49 = vpop.f32.mrf.mxu1 }
 0x2c2   :  { %v708_v40 = vpop.f32.mrf.mxu3 }
 0x2c3   :  { %v732_v41 = vpack.c.bf16 %v708_v40, %v708_v40 }
 0x2c5   :  { %v764_v45 = vunpack.c.l.b16 %v732_v41 }
 0x2c7   :  { %v774_v46 = vpack.c.b16 %v764_v45, %v763_v42 }
 0x2c9   :  { %948 = vmatmul.bf16.gmra.mxu0 %v774_v46 }
 0x2ca   :  { %v711_v48 = vpop.f32.mrf.mxu3 }
 0x2cb   :  { %v733_v52 = vpack.c.bf16 %v711_v48, %v711_v48 }
 0x2cd   :  { %v765_v55 = vunpack.c.l.b16 %v733_v52 }
 0x2d2   :  { %v713_v53 = vpop.f32.mrf.mxu3 }
 0x2d3   :  { %v734_v54 = vpack.c.bf16 %v713_v53, %v713_v53 }
 0x2d5   :  { %v766_v56 = vunpack.c.l.b16 %v734_v54 }
 0x2d7   :  { %v775_v44 = vpack.c.b16 %v766_v56, %v765_v55 }
 0x2d9   :  { %953 = vmatmul.bf16.gmra.mxu0 %v775_v44 }
 0x2da   :  { %v716_v34 = vpop.f32.mrf.mxu3 }
 0x2db   :  { %v735_v9 = vpack.c.bf16 %v716_v34, %v716_v34  ;;  %v993_v34 = vpop.f32.mrf.mxu1 }
 0x2dd   :  { %v767_v59 = vunpack.c.l.b16 %v735_v9 }
 0x2e2   :  { %v718_v10 = vpop.f32.mrf.mxu3 }
 0x2e3   :  { %v736_v11 = vpack.c.bf16 %v718_v10, %v718_v10 }
 0x2e5   :  { %v768_v60 = vunpack.c.l.b16 %v736_v11 }
 0x2e7   :  { %v776_v63 = vpack.c.b16 %v768_v60, %v767_v59  ;;  %v995_v59 = vpop.f32.mrf.mxu1 }
 0x2e9   :  { %958 = vmatmul.bf16.gmra.mxu0 %v776_v63 }
 0x2f6   :  { %v924_v5 = vpop.f32.mrf.mxu0 }
 0x2f7   :  { %v925_v6 = vadd.f32 %v924_v5, %v2826_v4 }
 0x2f9   :  { %v974_v2 = vadd.f32 %v973_v51, %v925_v6 }
 0x2fb   :  { %v1013_v14 = vmax.f32 %v974_v2, 0.0  ;;  %v998_v2 = vpop.f32.mrf.mxu1 }
 0x2fd   :  { %v1029_v13 = vpack.c.bf16 %v1013_v14, %v1013_v14 }
 0x2fe   :  { %v926_v12 = vpop.f32.mrf.mxu0 }
 0x2ff   :  { %v927_v15 = vadd.f32 %v926_v12, %v2826_v4  ;;  %v1061_v23 = vunpack.c.l.b16 %v1029_v13 }
 0x301   :  { %v976_v16 = vadd.f32 %v975_v58, %v927_v15 }
 0x303   :  { %v1014_v18 = vmax.f32 %v976_v16, 0.0 }
 0x305   :  { %v1030_v19 = vpack.c.bf16 %v1014_v18, %v1014_v18 }
 0x306   :  { %v929_v21 = vpop.f32.mrf.mxu0 }
 0x307   :  { %v1062_v24 = vunpack.c.l.b16 %v1030_v19  ;;  %v930_v25 = vadd.f32 %v929_v21, %v2826_v4 }
 0x309   :  { %v2831_v27 = vpack.c.b16 %v1062_v24, %v1061_v23  ;;  %v979_v28 = vadd.f32 %v978_v3, %v930_v25  ;;  %v1000_v25 = vpop.f32.mrf.mxu1 }
 0x30b   :  { %1393 = vmatmul.bf16.vlgmr.msra.gmra.mxu0 %v2831_v27  ;;  %v1015_v30 = vmax.f32 %v979_v28, 0.0 }
 0x30d   :  { %v1031_v33 = vpack.c.bf16 %v1015_v30, %v1015_v30 }
 0x30e   :  { %v931_v0 = vpop.f32.mrf.mxu0 }
 0x30f   :  { %v932_v31 = vadd.f32 %v931_v0, %v2826_v4  ;;  %v1063_v39 = vunpack.c.l.b16 %v1031_v33 }
 0x311   :  { %v981_v32 = vadd.f32 %v980_v7, %v932_v31  ;;  %v1003_v33 = vpop.f32.mrf.mxu1 }
 0x313   :  { %v1016_v35 = vmax.f32 %v981_v32, 0.0 }
 0x315   :  { %v1032_v36 = vpack.c.bf16 %v1016_v35, %v1016_v35 }
 0x316   :  { %v934_v38 = vpop.f32.mrf.mxu0 }
 0x317   :  { %v1064_v40 = vunpack.c.l.b16 %v1032_v36  ;;  %v935_v41 = vadd.f32 %v934_v38, %v2826_v4 }
 0x319   :  { %v2836_v42 = vpack.c.b16 %v1064_v40, %v1063_v39  ;;  %v984_v45 = vadd.f32 %v983_v17, %v935_v41 }
 0x31b   :  { %1398 = vmatmul.bf16.gmra.mxu0 %v2836_v42  ;;  %v1017_v47 = vmax.f32 %v984_v45, 0.0 }
 0x31d   :  { %v1033_v52 = vpack.c.bf16 %v1017_v47, %v1017_v47  ;;  %v1005_v47 = vpop.f32.mrf.mxu1 }
 0x31e   :  { %v936_v46 = vpop.f32.mrf.mxu0 }
 0x31f   :  { %v937_v48 = vadd.f32 %v936_v46, %v2826_v4  ;;  %v1065_v56 = vunpack.c.l.b16 %v1033_v52 }
 0x321   :  { %v986_v50 = vadd.f32 %v985_v29, %v937_v48 }
 0x323   :  { %v1018_v53 = vmax.f32 %v986_v50, 0.0 }
 0x325   :  { %v1034_v54 = vpack.c.bf16 %v1018_v53, %v1018_v53 }
 0x326   :  { %v939_v55 = vpop.f32.mrf.mxu0 }
 0x327   :  { %v1066_v57 = vunpack.c.l.b16 %v1034_v54  ;;  %v940_v44 = vadd.f32 %v939_v55, %v2826_v4 }
 0x329   :  { %v2841_v51 = vpack.c.b16 %v1066_v57, %v1065_v56  ;;  %v989_v1 = vadd.f32 %v988_v37, %v940_v44  ;;  %v1008_v56 = vpop.f32.mrf.mxu1 }
 0x32b   :  { %1403 = vmatmul.bf16.gmra.mxu0 %v2841_v51  ;;  %v1019_v9 = vmax.f32 %v989_v1, 0.0 }
 0x32d   :  { %v1035_v11 = vpack.c.bf16 %v1019_v9, %v1019_v9 }
 0x32e   :  { %v941_v8 = vpop.f32.mrf.mxu0 }
 0x32f   :  { %v942_v10 = vadd.f32 %v941_v8, %v2826_v4  ;;  %v1067_v63 = vunpack.c.l.b16 %v1035_v11 }
 0x331   :  { %v991_v61 = vadd.f32 %v990_v49, %v942_v10 }
 0x333   :  { %v1020_v58 = vmax.f32 %v991_v61, 0.0 }
 0x335   :  { %v1036_v60 = vpack.c.bf16 %v1020_v58, %v1020_v58  ;;  %v1010_v58 = vpop.f32.mrf.mxu1 }
 0x336   :  { %v944_v62 = vpop.f32.mrf.mxu0 }
 0x337   :  { %v1068_v3 = vunpack.c.l.b16 %v1036_v60  ;;  %v945_v5 = vadd.f32 %v944_v62, %v2826_v4 }
 0x339   :  { %v2846_v6 = vpack.c.b16 %v1068_v3, %v1067_v63  ;;  %v994_v7 = vadd.f32 %v993_v34, %v945_v5 }
 0x33b   :  { %1408 = vmatmul.bf16.gmra.mxu0 %v2846_v6  ;;  %v1021_v14 = vmax.f32 %v994_v7, 0.0 }
 0x33d   :  { %v1037_v17 = vpack.c.bf16 %v1021_v14, %v1021_v14  ;;  %v2473_v14 = vld [vmem:[#allocation4 + $0x28] sm:$0xff] }
 0x33e   :  { %v946_v12 = vpop.f32.mrf.mxu0 }
 0x33f   :  { %v947_v15 = vadd.f32 %v946_v12, %v2826_v4  ;;  %v1069_v21 = vunpack.c.l.b16 %v1037_v17  ;;  %v2472_v12 = vld [vmem:[#allocation4 + $0x10] sm:$0xff]  ;;  %v2388_v17 = vld [vmem:[#allocation7 + $0x108] sm:$0xff] }
 0x341   :  { %v996_v16 = vadd.f32 %v995_v59, %v947_v15  ;;  %v2394_v15 = vld [vmem:[#allocation7 + $0x138] sm:$0xff] }
 0x342   :  { %1336 = vmatpush.bf16.msrb.mxu3 %v2394_v15 }
 0x343   :  { %v1022_v13 = vmax.f32 %v996_v16, 0.0  ;;  %v2389_v16 = vld [vmem:[#allocation7 + $0x110] sm:$0xff] }
 0x345   :  { %v1038_v18 = vpack.c.bf16 %v1022_v13, %v1022_v13 }
 0x346   :  { %v949_v19 = vpop.f32.mrf.mxu0 }
 0x347   :  { %v1070_v23 = vunpack.c.l.b16 %v1038_v18  ;;  %v950_v24 = vadd.f32 %v949_v19, %v2826_v4 }
 0x349   :  { %v1081_v28 = vpack.c.b16 %v1070_v23, %v1069_v21  ;;  %v999_v29 = vadd.f32 %v998_v2, %v950_v24  ;;  %v2471_v2 = vld [vmem:[#allocation4 + $0x8] sm:$0xff] }
 0x34b   :  { %1413 = vmatmul.bf16.gmra.mxu0 %v1081_v28  ;;  %v1023_v30 = vmax.f32 %v999_v29, 0.0 }
 0x34d   :  { %v1039_v35 = vpack.c.bf16 %v1023_v30, %v1023_v30 }
 0x34e   :  { %v951_v0 = vpop.f32.mrf.mxu0 }
 0x34f   :  { %v952_v31 = vadd.f32 %v951_v0, %v2826_v4  ;;  %v1071_v39 = vunpack.c.l.b16 %v1039_v35 }
 0x351   :  { %v1001_v32 = vadd.f32 %v1000_v25, %v952_v31 }
 0x353   :  { %v1024_v36 = vmax.f32 %v1001_v32, 0.0 }
 0x355   :  { %v1040_v37 = vpack.c.bf16 %v1024_v36, %v1024_v36 }
 0x356   :  { %v954_v38 = vpop.f32.mrf.mxu0 }
 0x357   :  { %v1072_v40 = vunpack.c.l.b16 %v1040_v37  ;;  %v955_v41 = vadd.f32 %v954_v38, %v2826_v4 }
 0x359   :  { %v1082_v45 = vpack.c.b16 %v1072_v40, %v1071_v39  ;;  %v1004_v46 = vadd.f32 %v1003_v33, %v955_v41 }
 0x35b   :  { %1418 = vmatmul.bf16.gmra.mxu0 %v1082_v45  ;;  %v1025_v49 = vmax.f32 %v1004_v46, 0.0 }
 0x35d   :  { %v1041_v53 = vpack.c.bf16 %v1025_v49, %v1025_v49 }
 0x35e   :  { %v956_v48 = vpop.f32.mrf.mxu0 }
 0x35f   :  { %v957_v50 = vadd.f32 %v956_v48, %v2826_v4  ;;  %v1073_v44 = vunpack.c.l.b16 %v1041_v53 }
 0x361   :  { %v1006_v52 = vadd.f32 %v1005_v47, %v957_v50 }
 0x363   :  { %v1026_v54 = vmax.f32 %v1006_v52, 0.0 }
 0x365   :  { %v1042_v55 = vpack.c.bf16 %v1026_v54, %v1026_v54 }
 0x366   :  { %v959_v57 = vpop.f32.mrf.mxu0 }
 0x367   :  { %v1074_v34 = vunpack.c.l.b16 %v1042_v55  ;;  %v960_v1 = vadd.f32 %v959_v57, %v2826_v4 }
 0x369   :  { %v1083_v8 = vpack.c.b16 %v1074_v34, %v1073_v44  ;;  %v1009_v9 = vadd.f32 %v1008_v56, %v960_v1 }
 0x36b   :  { %1423 = vmatmul.bf16.gmra.mxu0 %v1083_v8  ;;  %v1027_v61 = vmax.f32 %v1009_v9, 0.0 }
 0x36d   :  { %v1043_v60 = vpack.c.bf16 %v1027_v61, %v1027_v61 }
 0x36e   :  { %v961_v10 = vpop.f32.mrf.mxu0 }
 0x36f   :  { %v962_v11 = vadd.f32 %v961_v10, %v2826_v4  ;;  %v1075_v3 = vunpack.c.l.b16 %v1043_v60  ;;  %v2470_v4 = vld [vmem:[#allocation4] sm:$0xff] }
 0x371   :  { %v1011_v59 = vadd.f32 %v1010_v58, %v962_v11 }
 0x373   :  { %v1028_v62 = vmax.f32 %v1011_v59, 0.0 }
 0x375   :  { %v1044_v63 = vpack.c.bf16 %v1028_v62, %v1028_v62 }
 0x377   :  { %v1076_v5 = vunpack.c.l.b16 %v1044_v63 }
 0x379   :  { %v1084_v7 = vpack.c.b16 %v1076_v5, %v1075_v3 }
 0x37b   :  { %1093 = vmatpush.bf16.msra.mxu2 %v1084_v7  ;;  %1428 = vmatmul.bf16.gmra.mxu0 %v1084_v7 }
 0x37f   :  { %1094 = vmatpush.bf16.msra.mxu2 %v1083_v8 }
 0x383   :  { %1095 = vmatpush.bf16.msra.mxu2 %v1082_v45 }
 0x387   :  { %1096 = vmatpush.bf16.msra.mxu2 %v1081_v28 }
 0x38b   :  { %1097 = vmatpush.bf16.msra.mxu2 %v2846_v6  ;;  %v2393_v6 = vld [vmem:[#allocation7 + $0x130] sm:$0xff] }
 0x38c   :  { %1337 = vmatpush.bf16.msrb.mxu3 %v2393_v6 }
 0x38f   :  { %1098 = vmatpush.bf16.msra.mxu2 %v2841_v51  ;;  %v2392_v51 = vld [vmem:[#allocation7 + $0x128] sm:$0xff] }
 0x390   :  { %1338 = vmatpush.bf16.msrb.mxu3 %v2392_v51 }
 0x393   :  { %1099 = vmatpush.bf16.msra.mxu2 %v2836_v42  ;;  %v2391_v42 = vld [vmem:[#allocation7 + $0x120] sm:$0xff] }
 0x394   :  { %1339 = vmatpush.bf16.msrb.mxu3 %v2391_v42 }
 0x397   :  { %1100 = vmatpush.bf16.msra.mxu2 %v2831_v27  ;;  %v2390_v27 = vld [vmem:[#allocation7 + $0x118] sm:$0xff] }
 0x398   :  { %1340 = vmatpush.bf16.msrb.mxu3 %v2390_v27 }
 0x39a   :  { %1101 = vmatmul.bf16.vlgmr.msra.gmra.mxu2 %v2470_v4  ;;  %v1394_v4 = vpop.f32.mrf.mxu0 }
 0x39c   :  { %1341 = vmatpush.bf16.msrb.mxu3 %v2389_v16 }
 0x3a0   :  { %1342 = vmatpush.bf16.msrb.mxu3 %v2388_v17  ;;  %v2864_v17 = vperm.slane %v2780_v43, 2 }
 0x3a2   :  { %v1396_v42 = vpop.f32.mrf.mxu0 }
 0x3aa   :  { %1106 = vmatmul.bf16.gmra.mxu2 %v2471_v2  ;;  %v1399_v27 = vpop.f32.mrf.mxu0 }
 0x3ba   :  { %1111 = vmatmul.bf16.gmra.mxu2 %v2472_v12 }
 0x3ca   :  { %1116 = vmatmul.bf16.gmra.mxu2 %v2762_v20  ;;  %v2387_v20 = vld [vmem:[#allocation7 + $0x100] sm:$0xff] }
 0x3cb   :  { %1343 = vmatpush.bf16.msrb.mxu3 %v2387_v20  ;;  %v1401_v20 = vpop.f32.mrf.mxu0 }
 0x3da   :  { %1121 = vmatmul.bf16.gmra.mxu2 %v2768_v26  ;;  %v2474_v26 = vld [vmem:[#allocation4 + $0x38] sm:$0xff] }
 0x3ea   :  { %1126 = vmatmul.bf16.gmra.mxu2 %v2473_v14 }
 0x3fa   :  { %1131 = vmatmul.bf16.gmra.mxu2 %v2764_v22 }
 0x40a   :  { %1136 = vmatmul.bf16.gmra.mxu2 %v2474_v26 }
 0x41d   :  { %v1102_v13 = vpop.f32.mrf.mxu2 }
 0x41e   :  { %v1142_v18 = vpack.c.bf16 %v1102_v13, %v1102_v13 }
 0x420   :  { %v1174_v23 = vunpack.c.l.b16 %v1142_v18 }
 0x425   :  { %v1104_v19 = vpop.f32.mrf.mxu2 }
 0x426   :  { %v1143_v21 = vpack.c.bf16 %v1104_v19, %v1104_v19 }
 0x428   :  { %v1175_v24 = vunpack.c.l.b16 %v1143_v21 }
 0x42a   :  { %v1190_v25 = vpack.c.b16 %v1175_v24, %v1174_v23  ;;  %v1404_v23 = vpop.f32.mrf.mxu0 }
 0x42c   :  { %1344 = vmatmul.bf16.vlgmr.msrb.gmra.mxu3 %v1190_v25 }
 0x42d   :  { %v1107_v28 = vpop.f32.mrf.mxu2 }
 0x42e   :  { %v1144_v22 = vpack.c.bf16 %v1107_v28, %v1107_v28 }
 0x430   :  { %v1176_v30 = vunpack.c.l.b16 %v1144_v22 }
 0x435   :  { %v1109_v29 = vpop.f32.mrf.mxu2 }
 0x436   :  { %v1145_v0 = vpack.c.bf16 %v1109_v29, %v1109_v29 }
 0x438   :  { %v1177_v31 = vunpack.c.l.b16 %v1145_v0  ;;  %v1406_v0 = vpop.f32.mrf.mxu0 }
 0x43a   :  { %v1191_v32 = vpack.c.b16 %v1177_v31, %v1176_v30 }
 0x43c   :  { %1349 = vmatmul.bf16.gmra.mxu3 %v1191_v32 }
 0x43d   :  { %v1112_v33 = vpop.f32.mrf.mxu2 }
 0x43e   :  { %v1146_v35 = vpack.c.bf16 %v1112_v33, %v1112_v33 }
 0x440   :  { %v1178_v38 = vunpack.c.l.b16 %v1146_v35 }
 0x445   :  { %v1114_v36 = vpop.f32.mrf.mxu2 }
 0x446   :  { %v1147_v37 = vpack.c.bf16 %v1114_v36, %v1114_v36 }
 0x448   :  { %v1179_v39 = vunpack.c.l.b16 %v1147_v37  ;;  %v1409_v37 = vpop.f32.mrf.mxu0 }
 0x44a   :  { %v1192_v40 = vpack.c.b16 %v1179_v39, %v1178_v38 }
 0x44c   :  { %1354 = vmatmul.bf16.gmra.mxu3 %v1192_v40 }
 0x44d   :  { %v1117_v41 = vpop.f32.mrf.mxu2 }
 0x44e   :  { %v1148_v45 = vpack.c.bf16 %v1117_v41, %v1117_v41 }
 0x450   :  { %v1180_v48 = vunpack.c.l.b16 %v1148_v45 }
 0x455   :  { %v1119_v46 = vpop.f32.mrf.mxu2 }
 0x456   :  { %v1149_v47 = vpack.c.bf16 %v1119_v46, %v1119_v46  ;;  %v1411_v46 = vpop.f32.mrf.mxu0 }
 0x458   :  { %v1181_v49 = vunpack.c.l.b16 %v1149_v47 }
 0x45a   :  { %v1193_v50 = vpack.c.b16 %v1181_v49, %v1180_v48 }
 0x45c   :  { %1359 = vmatmul.bf16.gmra.mxu3 %v1193_v50 }
 0x45d   :  { %v1122_v52 = vpop.f32.mrf.mxu2 }
 0x45e   :  { %v1150_v53 = vpack.c.bf16 %v1122_v52, %v1122_v52 }
 0x460   :  { %v1182_v56 = vunpack.c.l.b16 %v1150_v53  ;;  %v1414_v53 = vpop.f32.mrf.mxu0 }
 0x465   :  { %v1124_v54 = vpop.f32.mrf.mxu2 }
 0x466   :  { %v1151_v55 = vpack.c.bf16 %v1124_v54, %v1124_v54 }
 0x468   :  { %v1183_v57 = vunpack.c.l.b16 %v1151_v55 }
 0x46a   :  { %v1194_v44 = vpack.c.b16 %v1183_v57, %v1182_v56 }
 0x46c   :  { %1364 = vmatmul.bf16.gmra.mxu3 %v1194_v44 }
 0x46d   :  { %v1127_v34 = vpop.f32.mrf.mxu2 }
 0x46e   :  { %v1152_v1 = vpack.c.bf16 %v1127_v34, %v1127_v34 }
 0x470   :  { %v1184_v10 = vunpack.c.l.b16 %v1152_v1 }
 0x475   :  { %v1129_v8 = vpop.f32.mrf.mxu2 }
 0x476   :  { %v1153_v9 = vpack.c.bf16 %v1129_v8, %v1129_v8  ;;  %v1416_v8 = vpop.f32.mrf.mxu0 }
 0x478   :  { %v1185_v61 = vunpack.c.l.b16 %v1153_v9 }
 0x47a   :  { %v1195_v11 = vpack.c.b16 %v1185_v61, %v1184_v10 }
 0x47c   :  { %1369 = vmatmul.bf16.gmra.mxu3 %v1195_v11 }
 0x47d   :  { %v1132_v58 = vpop.f32.mrf.mxu2 }
 0x47e   :  { %v1154_v59 = vpack.c.bf16 %v1132_v58, %v1132_v58  ;;  %v1419_v58 = vpop.f32.mrf.mxu0 }
 0x480   :  { %v1186_v63 = vunpack.c.l.b16 %v1154_v59 }
 0x485   :  { %v1134_v60 = vpop.f32.mrf.mxu2 }
 0x486   :  { %v1155_v62 = vpack.c.bf16 %v1134_v60, %v1134_v60 }
 0x488   :  { %v1187_v3 = vunpack.c.l.b16 %v1155_v62  ;;  %v1421_v62 = vpop.f32.mrf.mxu0 }
 0x48a   :  { %v1196_v5 = vpack.c.b16 %v1187_v3, %v1186_v63 }
 0x48c   :  { %1374 = vmatmul.bf16.gmra.mxu3 %v1196_v5 }
 0x48d   :  { %v1137_v7 = vpop.f32.mrf.mxu2 }
 0x48e   :  { %v1156_v2 = vpack.c.bf16 %v1137_v7, %v1137_v7 }
 0x490   :  { %v1188_v15 = vunpack.c.l.b16 %v1156_v2  ;;  %v1424_v3 = vpop.f32.mrf.mxu0 }
 0x495   :  { %v1139_v12 = vpop.f32.mrf.mxu2 }
 0x496   :  { %v1157_v14 = vpack.c.bf16 %v1139_v12, %v1139_v12 }
 0x498   :  { %v1189_v6 = vunpack.c.l.b16 %v1157_v14  ;;  %v1426_v7 = vpop.f32.mrf.mxu0 }
 0x49a   :  { %v1197_v51 = vpack.c.b16 %v1189_v6, %v1188_v15 }
 0x49c   :  { %1379 = vmatmul.bf16.gmra.mxu3 %v1197_v51 }
 0x4a0   :  { %v1429_v2 = vpop.f32.mrf.mxu0 }
 0x4af   :  { %v1345_v16 = vpop.f32.mrf.mxu3 }
 0x4b0   :  { %v1346_v26 = vadd.f32 %v1345_v16, %v2864_v17  ;;  %v1431_v16 = vpop.f32.mrf.mxu0 }
 0x4b2   :  { %v1395_v18 = vadd.f32 %v1394_v4, %v1346_v26 }
 0x4b4   :  { %v1434_v24 = vmax.f32 %v1395_v18, 0.0 }
 0x4b7   :  { %v1347_v13 = vpop.f32.mrf.mxu3 }
 0x4b8   :  { %v1348_v19 = vadd.f32 %v1347_v13, %v2864_v17 }
 0x4ba   :  { %v1397_v21 = vadd.f32 %v1396_v42, %v1348_v19 }
 0x4bc   :  { %v1435_v25 = vmax.f32 %v1397_v21, 0.0 }
 0x4be   :  { %v2868_v28 = vpack.c.bf16 %v1435_v25, %v1434_v24 }
 0x4bf   :  { %v1350_v22 = vpop.f32.mrf.mxu3 }
 0x4c0   :  { %v1351_v29 = vadd.f32 %v1350_v22, %v2864_v17 }
 0x4c2   :  { %v1400_v43 = vadd.f32 %v1399_v27, %v1351_v29 }
 0x4c4   :  { %v1436_v33 = vmax.f32 %v1400_v43, 0.0 }
 0x4c7   :  { %v1352_v30 = vpop.f32.mrf.mxu3 }
 0x4c8   :  { %v1353_v31 = vadd.f32 %v1352_v30, %v2864_v17 }
 0x4ca   :  { %v1402_v32 = vadd.f32 %v1401_v20, %v1353_v31 }
 0x4cc   :  { %v1437_v35 = vmax.f32 %v1402_v32, 0.0 }
 0x4ce   :  { %v2872_v36 = vpack.c.bf16 %v1437_v35, %v1436_v33 }
 0x4cf   :  { %v1355_v38 = vpop.f32.mrf.mxu3 }
 0x4d0   :  { %v1356_v39 = vadd.f32 %v1355_v38, %v2864_v17 }
 0x4d2   :  { %v1405_v41 = vadd.f32 %v1404_v23, %v1356_v39 }
 0x4d4   :  { %v1438_v48 = vmax.f32 %v1405_v41, 0.0  ;;  %v2420_v41 = vld [vmem:[#allocation9 + $0x78] sm:$0xff] }
 0x4d5   :  { %1652 = vmatpush.bf16.msra.mxu3 %v2420_v41 }
 0x4d7   :  { %v1357_v40 = vpop.f32.mrf.mxu3 }
 0x4d8   :  { %v1358_v45 = vadd.f32 %v1357_v40, %v2864_v17  ;;  %v2412_v40 = vld [vmem:[#allocation9 + $0x38] sm:$0xff] }
 0x4d9   :  { %1638 = vmatpush.bf16.msrb.mxu2 %v2412_v40 }
 0x4da   :  { %v1407_v47 = vadd.f32 %v1406_v0, %v1358_v45  ;;  %v2419_v45 = vld [vmem:[#allocation9 + $0x70] sm:$0xff] }
 0x4db   :  { %1653 = vmatpush.bf16.msra.mxu3 %v2419_v45 }
 0x4dc   :  { %v1439_v49 = vmax.f32 %v1407_v47, 0.0  ;;  %v2418_v47 = vld [vmem:[#allocation9 + $0x68] sm:$0xff] }
 0x4de   :  { %v2876_v50 = vpack.c.bf16 %v1439_v49, %v1438_v48  ;;  %v2409_v48 = vld [vmem:[#allocation9 + $0x20] sm:$0xff] }
 0x4df   :  { %v1360_v52 = vpop.f32.mrf.mxu3  ;;  %1654 = vmatpush.bf16.msra.mxu3 %v2418_v47  ;;  %v2417_v49 = vld [vmem:[#allocation9 + $0x60] sm:$0xff] }
 0x4e0   :  { %v1361_v54 = vadd.f32 %v1360_v52, %v2864_v17  ;;  %v2403_v52 = vld [vmem:[#allocation6] sm:$0xff] }
 0x4e2   :  { %v1410_v56 = vadd.f32 %v1409_v37, %v1361_v54  ;;  %v2408_v54 = vld [vmem:[#allocation9 + $0x18] sm:$0xff] }
 0x4e3   :  { %1655 = vmatpush.bf16.msra.mxu3 %v2417_v49 }
 0x4e4   :  { %v1440_v34 = vmax.f32 %v1410_v56, 0.0  ;;  %v2406_v56 = vld [vmem:[#allocation9 + $0x8] sm:$0xff] }
 0x4e7   :  { %v1362_v55 = vpop.f32.mrf.mxu3 }
 0x4e8   :  { %v1363_v57 = vadd.f32 %v1362_v55, %v2864_v17  ;;  %v2416_v55 = vld [vmem:[#allocation9 + $0x58] sm:$0xff] }
 0x4e9   :  { %1656 = vmatpush.bf16.msra.mxu3 %v2416_v55 }
 0x4ea   :  { %v1412_v44 = vadd.f32 %v1411_v46, %v1363_v57  ;;  %v2410_v46 = vld [vmem:[#allocation9 + $0x28] sm:$0xff]  ;;  %v2415_v57 = vld [vmem:[#allocation9 + $0x50] sm:$0xff] }
 0x4ec   :  { %v1441_v1 = vmax.f32 %v1412_v44, 0.0  ;;  %v2414_v44 = vld [vmem:[#allocation9 + $0x48] sm:$0xff] }
 0x4ed   :  { %1657 = vmatpush.bf16.msra.mxu3 %v2415_v57 }
 0x4ee   :  { %v1453_v9 = vpack.c.bf16 %v1441_v1, %v1440_v34  ;;  %v2428_v34 = vld [vmem:[#allocation10 + $0x38] sm:$0xff] }
 0x4ef   :  { %v1365_v10 = vpop.f32.mrf.mxu3  ;;  %v2436_v1 = vld [vmem:[#allocation10 + $0x78] sm:$0xff] }
 0x4f0   :  { %v1366_v61 = vadd.f32 %v1365_v10, %v2864_v17  ;;  %v2427_v10 = vld [vmem:[#allocation10 + $0x30] sm:$0xff] }
 0x4f1   :  { %1658 = vmatpush.bf16.msra.mxu3 %v2414_v44 }
 0x4f2   :  { %v1415_v11 = vadd.f32 %v1414_v53, %v1366_v61  ;;  %v2404_v53 = vld [vmem:[#allocation6 + $0x8] sm:$0xff]  ;;  %v2435_v61 = vld [vmem:[#allocation10 + $0x70] sm:$0xff] }
 0x4f4   :  { %v1442_v38 = vmax.f32 %v1415_v11, 0.0  ;;  %v2443_v11 = vld [vmem:[#allocation10 + $0xb0] sm:$0xff] }
 0x4f7   :  { %v1367_v59 = vpop.f32.mrf.mxu3 }
 0x4f8   :  { %v1368_v24 = vadd.f32 %v1367_v59, %v2864_v17  ;;  %v2434_v59 = vld [vmem:[#allocation10 + $0x68] sm:$0xff] }
 0x4fa   :  { %v1417_v43 = vadd.f32 %v1416_v8, %v1368_v24  ;;  %v2421_v24 = vld [vmem:[#allocation10] sm:$0xff] }
 0x4fc   :  { %v1443_v35 = vmax.f32 %v1417_v43, 0.0 }
 0x4fe   :  { %v1454_v39 = vpack.c.bf16 %v1443_v35, %v1442_v38 }
 0x4ff   :  { %v1370_v60 = vpop.f32.mrf.mxu3 }
 0x500   :  { %v1371_v18 = vadd.f32 %v1370_v60, %v2864_v17  ;;  %v2442_v60 = vld [vmem:[#allocation10 + $0xa8] sm:$0xff] }
 0x502   :  { %v1420_v0 = vadd.f32 %v1419_v58, %v1371_v18  ;;  %v2426_v58 = vld [vmem:[#allocation10 + $0x28] sm:$0xff]  ;;  %v2423_v18 = vld [vmem:[#allocation10 + $0x10] sm:$0xff] }
 0x504   :  { %v1444_v33 = vmax.f32 %v1420_v0, 0.0  ;;  %v2438_v0 = vld [vmem:[#allocation10 + $0x88] sm:$0xff] }
 0x507   :  { %v1372_v63 = vpop.f32.mrf.mxu3 }
 0x508   :  { %v1373_v20 = vadd.f32 %v1372_v63, %v2864_v17 }
 0x50a   :  { %v1422_v25 = vadd.f32 %v1421_v62, %v1373_v20  ;;  %v2424_v20 = vld [vmem:[#allocation10 + $0x18] sm:$0xff] }
 0x50c   :  { %v1445_v31 = vmax.f32 %v1422_v25, 0.0  ;;  %v2430_v25 = vld [vmem:[#allocation10 + $0x48] sm:$0xff] }
 0x50e   :  { %v1455_v37 = vpack.c.bf16 %v1445_v31, %v1444_v33  ;;  %v2475_v31 = vld [vmem:[%s2906_s6] sm:$0xf] }
 0x50f   :  { %v1375_v5 = vpop.f32.mrf.mxu3 }
 0x510   :  { %v1376_v51 = vadd.f32 %v1375_v5, %v2864_v17  ;;  %v2425_v5 = vld [vmem:[#allocation10 + $0x20] sm:$0xff] }
 0x512   :  { %v1425_v19 = vadd.f32 %v1424_v3, %v1376_v51 }
 0x514   :  { %v1446_v30 = vmax.f32 %v1425_v19, 0.0  ;;  %v2422_v19 = vld [vmem:[#allocation10 + $0x8] sm:$0xff] }
 0x517   :  { %v1377_v4 = vpop.f32.mrf.mxu3 }
 0x518   :  { %v1378_v15 = vadd.f32 %v1377_v4, %v2864_v17 }
 0x51a   :  { %v1427_v26 = vadd.f32 %v1426_v7, %v1378_v15  ;;  %v2433_v7 = vld [vmem:[#allocation10 + $0x60] sm:$0xff] }
 0x51c   :  { %v1447_v22 = vmax.f32 %v1427_v26, 0.0  ;;  %v2432_v26 = vld [vmem:[#allocation10 + $0x58] sm:$0xff] }
 0x51e   :  { %v1456_v32 = vpack.c.bf16 %v1447_v22, %v1446_v30  ;;  %v2439_v22 = vld [vmem:[#allocation10 + $0x90] sm:$0xff]  ;;  %v2437_v30 = vld [vmem:[#allocation10 + $0x80] sm:$0xff] }
 0x51f   :  { %v1380_v12 = vpop.f32.mrf.mxu3 }
 0x520   :  { %v1381_v14 = vadd.f32 %v1380_v12, %v2864_v17 }
 0x522   :  { %v1430_v42 = vadd.f32 %v1429_v2, %v1381_v14 }
 0x524   :  { %v1448_v21 = vmax.f32 %v1430_v42, 0.0 }
 0x527   :  { %v1382_v6 = vpop.f32.mrf.mxu3 }
 0x528   :  { %v1383_v27 = vadd.f32 %v1382_v6, %v2864_v17  ;;  %v2411_v17 = vld [vmem:[#allocation9 + $0x30] sm:$0xff] }
 0x529   :  { %1639 = vmatpush.bf16.msrb.mxu2 %v2411_v17 }
 0x52a   :  { %v1432_v13 = vadd.f32 %v1431_v16, %v1383_v27 }
 0x52c   :  { %v1449_v23 = vmax.f32 %v1432_v13, 0.0  ;;  %v2441_v13 = vld [vmem:[#allocation10 + $0xa0] sm:$0xff] }
 0x52d   :  { %1640 = vmatpush.bf16.msrb.mxu2 %v2410_v46 }
 0x52e   :  { %v1457_v29 = vpack.c.bf16 %v1449_v23, %v1448_v21  ;;  %v2431_v21 = vld [vmem:[#allocation10 + $0x50] sm:$0xff]  ;;  %v2440_v23 = vld [vmem:[#allocation10 + $0x98] sm:$0xff] }
 0x530   :  { %1474 = vmatpush.bf16.msrb.mxu1 %v1457_v29  ;;  %v2429_v29 = vld [vmem:[#allocation10 + $0x40] sm:$0xff] }
 0x531   :  { %1641 = vmatpush.bf16.msrb.mxu2 %v2409_v48 }
 0x534   :  { %1475 = vmatpush.bf16.msrb.mxu1 %v1456_v32  ;;  %v1541_v32 = vperm.slane %v2475_v31, 3 }
 0x535   :  { %1642 = vmatpush.bf16.msrb.mxu2 %v2408_v54 }
 0x538   :  { %1476 = vmatpush.bf16.msrb.mxu1 %v1455_v37 }
 0x53c   :  { %1477 = vmatpush.bf16.msrb.mxu1 %v1454_v39 }
 0x540   :  { %1478 = vmatpush.bf16.msrb.mxu1 %v1453_v9  ;;  %v2444_v9 = vld [vmem:[#allocation10 + $0xb8] sm:$0xff] }
 0x544   :  { %1479 = vmatpush.bf16.msrb.mxu1 %v2876_v50  ;;  %v2407_v50 = vld [vmem:[#allocation9 + $0x10] sm:$0xff] }
 0x545   :  { %1643 = vmatpush.bf16.msrb.mxu2 %v2407_v50 }
 0x548   :  { %1480 = vmatpush.bf16.msrb.mxu1 %v2872_v36  ;;  %v2405_v36 = vld [vmem:[#allocation9] sm:$0xff] }
 0x549   :  { %1644 = vmatpush.bf16.msrb.mxu2 %v2406_v56 }
 0x54c   :  { %1481 = vmatpush.bf16.msrb.mxu1 %v2868_v28  ;;  %v2413_v28 = vld [vmem:[#allocation9 + $0x40] sm:$0xff] }
 0x54d   :  { %1645 = vmatpush.bf16.msrb.mxu2 %v2405_v36  ;;  %1659 = vmatpush.bf16.msra.mxu3 %v2413_v28 }
 0x54f   :  { %1482 = vmatmul.bf16.vlgmr.msrb.gmra.mxu1 %v2403_v52 }
 0x550   :  { %1867 = vmatpush.bf16.msra.mxu1 %v2428_v34 }
 0x551   :  { %1880 = vmatpush.bf16.msra.mxu2 %v2436_v1  ;;  %1893 = vmatpush.bf16.msrb.mxu3 %v2444_v9 }
 0x554   :  { %1868 = vmatpush.bf16.msra.mxu1 %v2427_v10 }
 0x555   :  { %1881 = vmatpush.bf16.msra.mxu2 %v2435_v61  ;;  %1894 = vmatpush.bf16.msrb.mxu3 %v2443_v11 }
 0x558   :  { %1869 = vmatpush.bf16.msra.mxu1 %v2426_v58 }
 0x559   :  { %1882 = vmatpush.bf16.msra.mxu2 %v2434_v59  ;;  %1895 = vmatpush.bf16.msrb.mxu3 %v2442_v60 }
 0x55c   :  { %1870 = vmatpush.bf16.msra.mxu1 %v2425_v5 }
 0x55d   :  { %1883 = vmatpush.bf16.msra.mxu2 %v2433_v7  ;;  %1896 = vmatpush.bf16.msrb.mxu3 %v2441_v13 }
 0x55f   :  { %1487 = vmatmul.bf16.gmra.mxu1 %v2404_v53  ;;  %v2469_v53 = vld [vmem:[%s2907_s7] ss:$0 sm:$0xff] }
 0x560   :  { %1871 = vmatpush.bf16.msra.mxu1 %v2424_v20 }
 0x561   :  { %1884 = vmatpush.bf16.msra.mxu2 %v2432_v26  ;;  %1897 = vmatpush.bf16.msrb.mxu3 %v2440_v23 }
 0x564   :  { %1872 = vmatpush.bf16.msra.mxu1 %v2423_v18 }
 0x565   :  { %1885 = vmatpush.bf16.msra.mxu2 %v2431_v21  ;;  %1898 = vmatpush.bf16.msrb.mxu3 %v2439_v22 }
 0x568   :  { %1873 = vmatpush.bf16.msra.mxu1 %v2422_v19 }
 0x569   :  { %1886 = vmatpush.bf16.msra.mxu2 %v2430_v25  ;;  %1899 = vmatpush.bf16.msrb.mxu3 %v2438_v0 }
 0x56c   :  { %1874 = vmatpush.bf16.msra.mxu1 %v2421_v24 }
 0x56d   :  { %1887 = vmatpush.bf16.msra.mxu2 %v2429_v29  ;;  %1900 = vmatpush.bf16.msrb.mxu3 %v2437_v30 }
 0x5cc   :  { %v1483_v8 = vpop.f32.mrf.mxu1 }
 0x5cd   :  { %v1493_v62 = vpack.c.bf16 %v1483_v8, %v1483_v8 }
 0x5cf   :  { %v1499_v4 = vunpack.c.l.b16 %v1493_v62 }
 0x5d4   :  { %v1485_v63 = vpop.f32.mrf.mxu1 }
 0x5d5   :  { %v1494_v3 = vpack.c.bf16 %v1485_v63, %v1485_v63 }
 0x5d7   :  { %v1500_v2 = vunpack.c.l.b16 %v1494_v3 }
 0x5d9   :  { %v1501_v12 = vpack.c.b16 %v1500_v2, %v1499_v4 }
 0x5db   :  { %1646 = vmatmul.bf16.vlgmr.msrb.gmra.mxu2 %v1501_v12 }
 0x5dc   :  { %v1488_v14 = vpop.f32.mrf.mxu1 }
 0x5dd   :  { %v1495_v15 = vpack.c.bf16 %v1488_v14, %v1488_v14 }
 0x5df   :  { %v1505_v42 = vunpack.c.l.b16 %v1495_v15 }
 0x5e4   :  { %v1490_v6 = vpop.f32.mrf.mxu1 }
 0x5e5   :  { %v1496_v51 = vpack.c.bf16 %v1490_v6, %v1490_v6 }
 0x5e7   :  { %v1506_v27 = vunpack.c.l.b16 %v1496_v51 }
 0x5e9   :  { %v1507_v16 = vpack.c.b16 %v1506_v27, %v1505_v42 }
 0x5eb   :  { %1660 = vmatmul.bf16.vlgmr.msra.gmra.mxu3 %v1507_v16 }
 0x65e   :  { %v1647_v43 = vpop.f32.mrf.mxu2 }
 0x65f   :  { %v1648_v33 = vadd.f32 %v1647_v43, %v1541_v32 }
 0x666   :  { %v1649_v39 = vpop.f32.mrf.mxu2 }
 0x667   :  { %v1650_v40 = vadd.f32 %v1649_v39, %v1541_v32 }
 0x66e   :  { %v1661_v35 = vpop.f32.mrf.mxu3 }
 0x66f   :  { %v1662_v37 = vadd.f32 %v1661_v35, %v1648_v33 }
 0x671   :  { %v1668_v38 = vpack.c.bf16 %v1662_v37, %v1662_v37 }
 0x673   :  { %1875 = vmatmul.bf16.vlgmr.msra.gmra.mxu1 %v1668_v38 }
 0x676   :  { %v1663_v41 = vpop.f32.mrf.mxu3 }
 0x677   :  { %v1664_v17 = vadd.f32 %v1663_v41, %v1650_v40 }
 0x679   :  { %v1666_v45 = vsub.f32 %v1662_v37, %v1664_v17  ;;  %v1669_v46 = vpack.c.bf16 %v1664_v17, %v1664_v17 }
 0x67b   :  { %v1667_v47 = vand.u32 2147483647, %v1666_v45  ;;  %1888 = vmatmul.bf16.vlgmr.msra.gmra.mxu2 %v1669_v46 }
 0x67d   :  { %v1670_v48 = vpack.c.bf16 %v1667_v47, %v1667_v47 }
 0x67f   :  { %1901 = vmatmul.bf16.vlgmr.msrb.gmra.mxu3 %v1670_v48 }
 0x6f0   :  { %v1876_v49 = vpop.f32.mrf.mxu1 }
 0x6f1   :  { %v1877_v50 = vadd.f32 %v2469_v53, %v1876_v49 }
 0x6f8   :  { %v1878_v52 = vpop.f32.mrf.mxu1 }
 0x6fe   :  { %v1889_v54 = vpop.f32.mrf.mxu2 }
 0x6ff   :  { %v1890_v55 = vadd.f32 %v1889_v54, %v1877_v50 }
 0x702   :  { %v1902_v56 = vpop.f32.mrf.mxu3 }
 0x703   :  { %v1903_v36 = vadd.f32 %v1902_v56, %v1890_v55 }
 0x705   :  { %1906 = vst [vmem:[%s2908_s8] sm:$0xff] %v1903_v36 }
 0x706   :  { %v1891_v57 = vpop.f32.mrf.mxu2 }
 0x70a   :  { %v1904_v44 = vpop.f32.mrf.mxu3 }
 0x70b   :  { %1911 = vsyncpa [#allocation3], 1 }
 0x70c   :  { %1912 = vsyncpa [#allocation5], 1 }
 0x70d   :  { %1913 = vsyncpa [#allocation8], 1 }
 0x70e   :  { %1914 = vsyncpa [#allocation11], 1 }

</bundles_post_ra>
